<compile_context>
chip_gen: v7x
topology: tpu7x:2x2x1
jax: 0.10.0
libtpu: 0.0.40
codegen_flags: <defaults>
</compile_context>

<pallas_src>
import functools

import numpy as np
import jax
import jax.numpy as jnp
from jax.experimental import pallas as pl
from jax.experimental.pallas import tpu as pltpu


def _round_up(x, m):
    return ((x + m - 1) // m) * m


def _fused_conv_conv_kernel(w1_ref, b1_ref, w2_ref, b2_ref, x_ref, m_ref,
                            o_ref, *, N, C1in, C1out, C2out, S, Lp, Lout,
                            dh2, dw2):
    """conv1 -> identity pool -> conv2, fused, on flat stride-S planes.

    w*_ref, b*_ref : flattened weights / bias in SMEM (scalar reads)
    x_ref : (C1in*N, Lin)  channel-stacked conv1 input, row-flattened with
            stride S and a zero head of `off` elements, so every conv tap is a
            single non-negative lane shift.
    m_ref : (1, Lp)        static 0/1 mask of the valid conv1-output positions
            inside conv2's zero-padded plane (junk cols / pad rows -> 0).
    o_ref : (C2out, N, Lout) conv2 output, flat stride-S rows padded to a
            lane-dense (128-multiple) width; wrapper strips the junk.
    """
    KH = KW = 2                      # both convs are 2x2
    x = x_ref[...]                   # one dense load, 6/8 sublanes used
    mask = m_ref[...]                # (1, Lp)

    # ---- conv1: the 4 tap shifts, hoisted & applied once to the full stack.
    sh1 = (0, 1, S, S + 1)
    xs = [x[:, s:s + Lp] for s in sh1]            # 4 views, (C1in*N, Lp)

    y1 = []                                       # conv1 output per channel
    for co in range(C1out):
        parts = []                                # independent per-ci chains
        for ci in range(C1in):
            r = ci * N
            base = (co * C1in + ci) * KH * KW
            p0 = (w1_ref[base + 0] * xs[0][r:r + N, :]
                  + w1_ref[base + 1] * xs[1][r:r + N, :])
            p1 = (w1_ref[base + 2] * xs[2][r:r + N, :]
                  + w1_ref[base + 3] * xs[3][r:r + N, :])
            parts.append(p0 + p1)
        acc = (parts[0] + parts[1]) + (parts[2] + b1_ref[co])
        # Zero junk columns / pad region: these ARE conv2's zero-pad positions.
        y1.append(acc * mask)

    # ---- pool2d (MyModule): identity, because conv1 emits 3 channels.

    # ---- conv2: stack channels once, hoist the 4 dilated tap shifts.
    y1s = jnp.concatenate(y1, axis=0)             # (C1out*N, Lp)
    sh2 = (0, dw2, dh2 * S, dh2 * S + dw2)
    ys = [y1s[:, s:s + Lout] for s in sh2]        # 4 views, (C1out*N, Lout)

    for co in range(C2out):
        parts = []
        for ci in range(C1out):
            r = ci * N
            base = (co * C1out + ci) * KH * KW
            p0 = (w2_ref[base + 0] * ys[0][r:r + N, :]
                  + w2_ref[base + 1] * ys[1][r:r + N, :])
            p1 = (w2_ref[base + 2] * ys[2][r:r + N, :]
                  + w2_ref[base + 3] * ys[3][r:r + N, :])
            parts.append(p0 + p1)
        # Full-width, lane-dense (unmasked) store; junk tail stripped outside.
        o_ref[co] = (parts[0] + parts[1]) + (parts[2] + b2_ref[co])


def model_forward(x, params):
    """conv2(pool(conv1(x))) as one fused Pallas kernel. x: (N, 3, H, W)."""
    w1, b1, w2, b2 = params
    N, C1in, H, W = x.shape
    C1out = w1.shape[0]
    C2out = w2.shape[0]
    KH = KW = 2
    ph2, pw2 = 3, 1
    dh2, dw2 = 3, 2

    # MyModule is an identity exactly when conv1's channel count is 0/3/5.
    assert C1out in (0, 3, 5), "pool branch would not be identity"

    # conv1 (valid) output geometry.
    H1o, W1o = H - (KH - 1), W - (KW - 1)
    # conv2 geometry on the zero-padded conv1 output.
    Hp2, Wp2 = H1o + 2 * ph2, W1o + 2 * pw2
    H2o = Hp2 - (dh2 * (KH - 1) + 1) + 1
    W2o = Wp2 - (dw2 * (KW - 1) + 1) + 1

    # Common flat row stride = conv2-padded width (also >= W so x rows fit).
    S = Wp2
    assert S >= W
    off = ph2 * S + pw2          # flat offset of conv1-out[0,0] in padded plane
    L2 = H2o * S                 # live length of one conv2 output plane
    Lout = _round_up(L2, 128)    # lane-dense output width (unmasked stores)
    Lp = Lout + dh2 * (KH - 1) * S + dw2 * (KW - 1)      # conv1 plane length
    Lin = _round_up(Lp + (KH - 1) * S + (KW - 1), 128)   # conv1 input row len
    assert Lp >= off + (H1o - 1) * S + W1o
    assert Lin >= off + H * S

    # Layout plumbing (tiny; fuses into one XLA transpose/pad op):
    # (N, C, H, W) -> channel-stacked flat planes (C*N, Lin) with stride S and
    # a zero head of `off`, so conv taps never index negatively.
    xT = jnp.transpose(x.astype(jnp.float32), (1, 0, 2, 3))       # (C,N,H,W)
    xT = jnp.pad(xT, ((0, 0), (0, 0), (0, 0), (0, S - W)))        # (C,N,H,S)
    x_flat = xT.reshape(C1in * N, H * S)
    x_emb = jnp.pad(x_flat, ((0, 0), (off, Lin - off - H * S)))   # (C*N, Lin)

    # Static validity mask (compile-time numpy constant, passed as VMEM input).
    q = np.arange(Lp)
    m = (q >= off) & (q - off < H1o * S) & ((q - off) % S < W1o)
    mask = jnp.asarray(m.astype(np.float32)[None, :])             # (1, Lp)

    kernel = functools.partial(
        _fused_conv_conv_kernel,
        N=N, C1in=C1in, C1out=C1out, C2out=C2out, S=S,
        Lp=Lp, Lout=Lout, dh2=dh2, dw2=dw2)

    flops = 2 * N * KH * KW * (C1out * C1in * H1o * W1o
                               + C2out * C1out * H2o * W2o)
    bytes_accessed = 4 * (x_emb.size + mask.size + w1.size + b1.size
                          + w2.size + b2.size + C2out * N * Lout)

    out_flat = pl.pallas_call(
        kernel,
        out_shape=jax.ShapeDtypeStruct((C2out, N, Lout), jnp.float32),
        in_specs=[pl.BlockSpec(memory_space=pltpu.MemorySpace.SMEM)] * 4
                 + [pl.BlockSpec(memory_space=pltpu.MemorySpace.VMEM)] * 2,
        out_specs=pl.BlockSpec(memory_space=pltpu.MemorySpace.VMEM),
        cost_estimate=pl.CostEstimate(flops=flops, transcendentals=0,
                                      bytes_accessed=bytes_accessed),
    )(w1.astype(jnp.float32).reshape(-1), b1.astype(jnp.float32),
      w2.astype(jnp.float32).reshape(-1), b2.astype(jnp.float32),
      x_emb, mask)

    # Strip junk columns (free reshape + tiny slice) and return NCHW.
    out = out_flat[:, :, :L2].reshape(C2out, N, H2o, S)[:, :, :, :W2o]
    return jnp.transpose(out, (1, 0, 2, 3))


def init_params(key):
    """Deterministic params, PyTorch Conv2d default-init style (uniform)."""
    k1, k2, k3, k4 = jax.random.split(key, 4)
    fan_in = 3 * 2 * 2
    bound = 1.0 / jnp.sqrt(fan_in)
    w1 = jax.random.uniform(k1, (3, 3, 2, 2), jnp.float32, -bound, bound)
    b1 = jax.random.uniform(k2, (3,), jnp.float32, -bound, bound)
    w2 = jax.random.uniform(k3, (3, 3, 2, 2), jnp.float32, -bound, bound)
    b2 = jax.random.uniform(k4, (3,), jnp.float32, -bound, bound)
    return w1, b1, w2, b2


def _conv_ref(x, w, b, padding, dilation):
    out = jax.lax.conv_general_dilated(
        x.astype(jnp.float32), w.astype(jnp.float32),
        window_strides=(1, 1),
        padding=[(padding[0], padding[0]), (padding[1], padding[1])],
        rhs_dilation=dilation,
        dimension_numbers=('NCHW', 'OIHW', 'NCHW'))
    return out + b[None, :, None, None]


def model_forward_ref(x, params):
    w1, b1, w2, b2 = params
    y = _conv_ref(x, w1, b1, (0, 0), (1, 1))
    y = _conv_ref(y, w2, b2, (3, 1), (3, 2))
    return y


if __name__ == "__main__":
    key = jax.random.PRNGKey(0)
    kx, kp = jax.random.split(key)

    # Small input consistent with the module: NCHW, 3 input channels.
    x = jax.random.uniform(kx, (2, 3, 16, 16), jnp.float32, 0.0, 100.0)
    params = init_params(kp)

    out = jax.block_until_ready(model_forward(x, params))

    # Sanity check against XLA's reference convolution.
    ref = jax.block_until_ready(model_forward_ref(x, params))
    assert out.shape == ref.shape, (out.shape, ref.shape)
    assert jnp.allclose(out, ref, atol=1e-2, rtol=1e-3), \
        float(jnp.max(jnp.abs(out - ref)))

    print("KERNEL_OK")
</pallas_src>

<mosaic_0001>
module attributes {stable_mosaic.version = 11 : i64} {
  func.func @_fused_conv_conv_kernel(%arg0: memref<36xf32, #tpu.memory_space<smem>>, %arg1: memref<3xf32, #tpu.memory_space<smem>>, %arg2: memref<36xf32, #tpu.memory_space<smem>>, %arg3: memref<3xf32, #tpu.memory_space<smem>>, %arg4: memref<6x512xf32, #tpu.memory_space<vmem>>, %arg5: memref<1x437xf32, #tpu.memory_space<vmem>>, %arg6: memref<3x2x384xf32, #tpu.memory_space<vmem>>) attributes {dimension_semantics = [], scalar_prefetch = 0 : i64, scratch_operands = 0 : i64, tpu.core_type = #tpu.core_type<tc>} {
    %c0 = arith.constant 0 : index
    %c0_0 = arith.constant 0 : index
    %0 = vector.load %arg4[%c0, %c0_0] : memref<6x512xf32, #tpu.memory_space<vmem>>, vector<6x512xf32>
    %c0_1 = arith.constant 0 : index
    %c0_2 = arith.constant 0 : index
    %1 = vector.load %arg5[%c0_1, %c0_2] : memref<1x437xf32, #tpu.memory_space<vmem>>, vector<1x437xf32>
    %2 = vector.extract_strided_slice %0 {offsets = [0, 0], sizes = [6, 437], strides = [1, 1]} : vector<6x512xf32> to vector<6x437xf32>
    %3 = vector.extract_strided_slice %0 {offsets = [0, 1], sizes = [6, 437], strides = [1, 1]} : vector<6x512xf32> to vector<6x437xf32>
    %4 = vector.extract_strided_slice %0 {offsets = [0, 17], sizes = [6, 437], strides = [1, 1]} : vector<6x512xf32> to vector<6x437xf32>
    %5 = vector.extract_strided_slice %0 {offsets = [0, 18], sizes = [6, 437], strides = [1, 1]} : vector<6x512xf32> to vector<6x437xf32>
    %c0_3 = arith.constant 0 : index
    %6 = memref.load %arg0[%c0_3] : memref<36xf32, #tpu.memory_space<smem>>
    %7 = vector.extract_strided_slice %2 {offsets = [0, 0], sizes = [2, 437], strides = [1, 1]} : vector<6x437xf32> to vector<2x437xf32>
    %8 = vector.broadcast %6 : f32 to vector<2x437xf32>
    %9 = arith.mulf %8, %7 : vector<2x437xf32>
    %c1 = arith.constant 1 : index
    %10 = memref.load %arg0[%c1] : memref<36xf32, #tpu.memory_space<smem>>
    %11 = vector.extract_strided_slice %3 {offsets = [0, 0], sizes = [2, 437], strides = [1, 1]} : vector<6x437xf32> to vector<2x437xf32>
    %12 = vector.broadcast %10 : f32 to vector<2x437xf32>
    %13 = arith.mulf %12, %11 : vector<2x437xf32>
    %14 = arith.addf %9, %13 : vector<2x437xf32>
    %c2 = arith.constant 2 : index
    %15 = memref.load %arg0[%c2] : memref<36xf32, #tpu.memory_space<smem>>
    %16 = vector.extract_strided_slice %4 {offsets = [0, 0], sizes = [2, 437], strides = [1, 1]} : vector<6x437xf32> to vector<2x437xf32>
    %17 = vector.broadcast %15 : f32 to vector<2x437xf32>
    %18 = arith.mulf %17, %16 : vector<2x437xf32>
    %c3 = arith.constant 3 : index
    %19 = memref.load %arg0[%c3] : memref<36xf32, #tpu.memory_space<smem>>
    %20 = vector.extract_strided_slice %5 {offsets = [0, 0], sizes = [2, 437], strides = [1, 1]} : vector<6x437xf32> to vector<2x437xf32>
    %21 = vector.broadcast %19 : f32 to vector<2x437xf32>
    %22 = arith.mulf %21, %20 : vector<2x437xf32>
    %23 = arith.addf %18, %22 : vector<2x437xf32>
    %24 = arith.addf %14, %23 : vector<2x437xf32>
    %c4 = arith.constant 4 : index
    %25 = memref.load %arg0[%c4] : memref<36xf32, #tpu.memory_space<smem>>
    %26 = vector.extract_strided_slice %2 {offsets = [2, 0], sizes = [2, 437], strides = [1, 1]} : vector<6x437xf32> to vector<2x437xf32>
    %27 = vector.broadcast %25 : f32 to vector<2x437xf32>
    %28 = arith.mulf %27, %26 : vector<2x437xf32>
    %c5 = arith.constant 5 : index
    %29 = memref.load %arg0[%c5] : memref<36xf32, #tpu.memory_space<smem>>
    %30 = vector.extract_strided_slice %3 {offsets = [2, 0], sizes = [2, 437], strides = [1, 1]} : vector<6x437xf32> to vector<2x437xf32>
    %31 = vector.broadcast %29 : f32 to vector<2x437xf32>
    %32 = arith.mulf %31, %30 : vector<2x437xf32>
    %33 = arith.addf %28, %32 : vector<2x437xf32>
    %c6 = arith.constant 6 : index
    %34 = memref.load %arg0[%c6] : memref<36xf32, #tpu.memory_space<smem>>
    %35 = vector.extract_strided_slice %4 {offsets = [2, 0], sizes = [2, 437], strides = [1, 1]} : vector<6x437xf32> to vector<2x437xf32>
    %36 = vector.broadcast %34 : f32 to vector<2x437xf32>
    %37 = arith.mulf %36, %35 : vector<2x437xf32>
    %c7 = arith.constant 7 : index
    %38 = memref.load %arg0[%c7] : memref<36xf32, #tpu.memory_space<smem>>
    %39 = vector.extract_strided_slice %5 {offsets = [2, 0], sizes = [2, 437], strides = [1, 1]} : vector<6x437xf32> to vector<2x437xf32>
    %40 = vector.broadcast %38 : f32 to vector<2x437xf32>
    %41 = arith.mulf %40, %39 : vector<2x437xf32>
    %42 = arith.addf %37, %41 : vector<2x437xf32>
    %43 = arith.addf %33, %42 : vector<2x437xf32>
    %c8 = arith.constant 8 : index
    %44 = memref.load %arg0[%c8] : memref<36xf32, #tpu.memory_space<smem>>
    %45 = vector.extract_strided_slice %2 {offsets = [4, 0], sizes = [2, 437], strides = [1, 1]} : vector<6x437xf32> to vector<2x437xf32>
    %46 = vector.broadcast %44 : f32 to vector<2x437xf32>
    %47 = arith.mulf %46, %45 : vector<2x437xf32>
    %c9 = arith.constant 9 : index
    %48 = memref.load %arg0[%c9] : memref<36xf32, #tpu.memory_space<smem>>
    %49 = vector.extract_strided_slice %3 {offsets = [4, 0], sizes = [2, 437], strides = [1, 1]} : vector<6x437xf32> to vector<2x437xf32>
    %50 = vector.broadcast %48 : f32 to vector<2x437xf32>
    %51 = arith.mulf %50, %49 : vector<2x437xf32>
    %52 = arith.addf %47, %51 : vector<2x437xf32>
    %c10 = arith.constant 10 : index
    %53 = memref.load %arg0[%c10] : memref<36xf32, #tpu.memory_space<smem>>
    %54 = vector.extract_strided_slice %4 {offsets = [4, 0], sizes = [2, 437], strides = [1, 1]} : vector<6x437xf32> to vector<2x437xf32>
    %55 = vector.broadcast %53 : f32 to vector<2x437xf32>
    %56 = arith.mulf %55, %54 : vector<2x437xf32>
    %c11 = arith.constant 11 : index
    %57 = memref.load %arg0[%c11] : memref<36xf32, #tpu.memory_space<smem>>
    %58 = vector.extract_strided_slice %5 {offsets = [4, 0], sizes = [2, 437], strides = [1, 1]} : vector<6x437xf32> to vector<2x437xf32>
    %59 = vector.broadcast %57 : f32 to vector<2x437xf32>
    %60 = arith.mulf %59, %58 : vector<2x437xf32>
    %61 = arith.addf %56, %60 : vector<2x437xf32>
    %62 = arith.addf %52, %61 : vector<2x437xf32>
    %63 = arith.addf %24, %43 : vector<2x437xf32>
    %c0_4 = arith.constant 0 : index
    %64 = memref.load %arg1[%c0_4] : memref<3xf32, #tpu.memory_space<smem>>
    %65 = vector.broadcast %64 : f32 to vector<2x437xf32>
    %66 = arith.addf %62, %65 : vector<2x437xf32>
    %67 = arith.addf %63, %66 : vector<2x437xf32>
    %68 = vector.broadcast %1 : vector<1x437xf32> to vector<2x437xf32>
    %69 = arith.mulf %67, %68 : vector<2x437xf32>
    %c12 = arith.constant 12 : index
    %70 = memref.load %arg0[%c12] : memref<36xf32, #tpu.memory_space<smem>>
    %71 = vector.extract_strided_slice %2 {offsets = [0, 0], sizes = [2, 437], strides = [1, 1]} : vector<6x437xf32> to vector<2x437xf32>
    %72 = vector.broadcast %70 : f32 to vector<2x437xf32>
    %73 = arith.mulf %72, %71 : vector<2x437xf32>
    %c13 = arith.constant 13 : index
    %74 = memref.load %arg0[%c13] : memref<36xf32, #tpu.memory_space<smem>>
    %75 = vector.extract_strided_slice %3 {offsets = [0, 0], sizes = [2, 437], strides = [1, 1]} : vector<6x437xf32> to vector<2x437xf32>
    %76 = vector.broadcast %74 : f32 to vector<2x437xf32>
    %77 = arith.mulf %76, %75 : vector<2x437xf32>
    %78 = arith.addf %73, %77 : vector<2x437xf32>
    %c14 = arith.constant 14 : index
    %79 = memref.load %arg0[%c14] : memref<36xf32, #tpu.memory_space<smem>>
    %80 = vector.extract_strided_slice %4 {offsets = [0, 0], sizes = [2, 437], strides = [1, 1]} : vector<6x437xf32> to vector<2x437xf32>
    %81 = vector.broadcast %79 : f32 to vector<2x437xf32>
    %82 = arith.mulf %81, %80 : vector<2x437xf32>
    %c15 = arith.constant 15 : index
    %83 = memref.load %arg0[%c15] : memref<36xf32, #tpu.memory_space<smem>>
    %84 = vector.extract_strided_slice %5 {offsets = [0, 0], sizes = [2, 437], strides = [1, 1]} : vector<6x437xf32> to vector<2x437xf32>
    %85 = vector.broadcast %83 : f32 to vector<2x437xf32>
    %86 = arith.mulf %85, %84 : vector<2x437xf32>
    %87 = arith.addf %82, %86 : vector<2x437xf32>
    %88 = arith.addf %78, %87 : vector<2x437xf32>
    %c16 = arith.constant 16 : index
    %89 = memref.load %arg0[%c16] : memref<36xf32, #tpu.memory_space<smem>>
    %90 = vector.extract_strided_slice %2 {offsets = [2, 0], sizes = [2, 437], strides = [1, 1]} : vector<6x437xf32> to vector<2x437xf32>
    %91 = vector.broadcast %89 : f32 to vector<2x437xf32>
    %92 = arith.mulf %91, %90 : vector<2x437xf32>
    %c17 = arith.constant 17 : index
    %93 = memref.load %arg0[%c17] : memref<36xf32, #tpu.memory_space<smem>>
    %94 = vector.extract_strided_slice %3 {offsets = [2, 0], sizes = [2, 437], strides = [1, 1]} : vector<6x437xf32> to vector<2x437xf32>
    %95 = vector.broadcast %93 : f32 to vector<2x437xf32>
    %96 = arith.mulf %95, %94 : vector<2x437xf32>
    %97 = arith.addf %92, %96 : vector<2x437xf32>
    %c18 = arith.constant 18 : index
    %98 = memref.load %arg0[%c18] : memref<36xf32, #tpu.memory_space<smem>>
    %99 = vector.extract_strided_slice %4 {offsets = [2, 0], sizes = [2, 437], strides = [1, 1]} : vector<6x437xf32> to vector<2x437xf32>
    %100 = vector.broadcast %98 : f32 to vector<2x437xf32>
    %101 = arith.mulf %100, %99 : vector<2x437xf32>
    %c19 = arith.constant 19 : index
    %102 = memref.load %arg0[%c19] : memref<36xf32, #tpu.memory_space<smem>>
    %103 = vector.extract_strided_slice %5 {offsets = [2, 0], sizes = [2, 437], strides = [1, 1]} : vector<6x437xf32> to vector<2x437xf32>
    %104 = vector.broadcast %102 : f32 to vector<2x437xf32>
    %105 = arith.mulf %104, %103 : vector<2x437xf32>
    %106 = arith.addf %101, %105 : vector<2x437xf32>
    %107 = arith.addf %97, %106 : vector<2x437xf32>
    %c20 = arith.constant 20 : index
    %108 = memref.load %arg0[%c20] : memref<36xf32, #tpu.memory_space<smem>>
    %109 = vector.extract_strided_slice %2 {offsets = [4, 0], sizes = [2, 437], strides = [1, 1]} : vector<6x437xf32> to vector<2x437xf32>
    %110 = vector.broadcast %108 : f32 to vector<2x437xf32>
    %111 = arith.mulf %110, %109 : vector<2x437xf32>
    %c21 = arith.constant 21 : index
    %112 = memref.load %arg0[%c21] : memref<36xf32, #tpu.memory_space<smem>>
    %113 = vector.extract_strided_slice %3 {offsets = [4, 0], sizes = [2, 437], strides = [1, 1]} : vector<6x437xf32> to vector<2x437xf32>
    %114 = vector.broadcast %112 : f32 to vector<2x437xf32>
    %115 = arith.mulf %114, %113 : vector<2x437xf32>
    %116 = arith.addf %111, %115 : vector<2x437xf32>
    %c22 = arith.constant 22 : index
    %117 = memref.load %arg0[%c22] : memref<36xf32, #tpu.memory_space<smem>>
    %118 = vector.extract_strided_slice %4 {offsets = [4, 0], sizes = [2, 437], strides = [1, 1]} : vector<6x437xf32> to vector<2x437xf32>
    %119 = vector.broadcast %117 : f32 to vector<2x437xf32>
    %120 = arith.mulf %119, %118 : vector<2x437xf32>
    %c23 = arith.constant 23 : index
    %121 = memref.load %arg0[%c23] : memref<36xf32, #tpu.memory_space<smem>>
    %122 = vector.extract_strided_slice %5 {offsets = [4, 0], sizes = [2, 437], strides = [1, 1]} : vector<6x437xf32> to vector<2x437xf32>
    %123 = vector.broadcast %121 : f32 to vector<2x437xf32>
    %124 = arith.mulf %123, %122 : vector<2x437xf32>
    %125 = arith.addf %120, %124 : vector<2x437xf32>
    %126 = arith.addf %116, %125 : vector<2x437xf32>
    %127 = arith.addf %88, %107 : vector<2x437xf32>
    %c1_5 = arith.constant 1 : index
    %128 = memref.load %arg1[%c1_5] : memref<3xf32, #tpu.memory_space<smem>>
    %129 = vector.broadcast %128 : f32 to vector<2x437xf32>
    %130 = arith.addf %126, %129 : vector<2x437xf32>
    %131 = arith.addf %127, %130 : vector<2x437xf32>
    %132 = vector.broadcast %1 : vector<1x437xf32> to vector<2x437xf32>
    %133 = arith.mulf %131, %132 : vector<2x437xf32>
    %c24 = arith.constant 24 : index
    %134 = memref.load %arg0[%c24] : memref<36xf32, #tpu.memory_space<smem>>
    %135 = vector.extract_strided_slice %2 {offsets = [0, 0], sizes = [2, 437], strides = [1, 1]} : vector<6x437xf32> to vector<2x437xf32>
    %136 = vector.broadcast %134 : f32 to vector<2x437xf32>
    %137 = arith.mulf %136, %135 : vector<2x437xf32>
    %c25 = arith.constant 25 : index
    %138 = memref.load %arg0[%c25] : memref<36xf32, #tpu.memory_space<smem>>
    %139 = vector.extract_strided_slice %3 {offsets = [0, 0], sizes = [2, 437], strides = [1, 1]} : vector<6x437xf32> to vector<2x437xf32>
    %140 = vector.broadcast %138 : f32 to vector<2x437xf32>
    %141 = arith.mulf %140, %139 : vector<2x437xf32>
    %142 = arith.addf %137, %141 : vector<2x437xf32>
    %c26 = arith.constant 26 : index
    %143 = memref.load %arg0[%c26] : memref<36xf32, #tpu.memory_space<smem>>
    %144 = vector.extract_strided_slice %4 {offsets = [0, 0], sizes = [2, 437], strides = [1, 1]} : vector<6x437xf32> to vector<2x437xf32>
    %145 = vector.broadcast %143 : f32 to vector<2x437xf32>
    %146 = arith.mulf %145, %144 : vector<2x437xf32>
    %c27 = arith.constant 27 : index
    %147 = memref.load %arg0[%c27] : memref<36xf32, #tpu.memory_space<smem>>
    %148 = vector.extract_strided_slice %5 {offsets = [0, 0], sizes = [2, 437], strides = [1, 1]} : vector<6x437xf32> to vector<2x437xf32>
    %149 = vector.broadcast %147 : f32 to vector<2x437xf32>
    %150 = arith.mulf %149, %148 : vector<2x437xf32>
    %151 = arith.addf %146, %150 : vector<2x437xf32>
    %152 = arith.addf %142, %151 : vector<2x437xf32>
    %c28 = arith.constant 28 : index
    %153 = memref.load %arg0[%c28] : memref<36xf32, #tpu.memory_space<smem>>
    %154 = vector.extract_strided_slice %2 {offsets = [2, 0], sizes = [2, 437], strides = [1, 1]} : vector<6x437xf32> to vector<2x437xf32>
    %155 = vector.broadcast %153 : f32 to vector<2x437xf32>
    %156 = arith.mulf %155, %154 : vector<2x437xf32>
    %c29 = arith.constant 29 : index
    %157 = memref.load %arg0[%c29] : memref<36xf32, #tpu.memory_space<smem>>
    %158 = vector.extract_strided_slice %3 {offsets = [2, 0], sizes = [2, 437], strides = [1, 1]} : vector<6x437xf32> to vector<2x437xf32>
    %159 = vector.broadcast %157 : f32 to vector<2x437xf32>
    %160 = arith.mulf %159, %158 : vector<2x437xf32>
    %161 = arith.addf %156, %160 : vector<2x437xf32>
    %c30 = arith.constant 30 : index
    %162 = memref.load %arg0[%c30] : memref<36xf32, #tpu.memory_space<smem>>
    %163 = vector.extract_strided_slice %4 {offsets = [2, 0], sizes = [2, 437], strides = [1, 1]} : vector<6x437xf32> to vector<2x437xf32>
    %164 = vector.broadcast %162 : f32 to vector<2x437xf32>
    %165 = arith.mulf %164, %163 : vector<2x437xf32>
    %c31 = arith.constant 31 : index
    %166 = memref.load %arg0[%c31] : memref<36xf32, #tpu.memory_space<smem>>
    %167 = vector.extract_strided_slice %5 {offsets = [2, 0], sizes = [2, 437], strides = [1, 1]} : vector<6x437xf32> to vector<2x437xf32>
    %168 = vector.broadcast %166 : f32 to vector<2x437xf32>
    %169 = arith.mulf %168, %167 : vector<2x437xf32>
    %170 = arith.addf %165, %169 : vector<2x437xf32>
    %171 = arith.addf %161, %170 : vector<2x437xf32>
    %c32 = arith.constant 32 : index
    %172 = memref.load %arg0[%c32] : memref<36xf32, #tpu.memory_space<smem>>
    %173 = vector.extract_strided_slice %2 {offsets = [4, 0], sizes = [2, 437], strides = [1, 1]} : vector<6x437xf32> to vector<2x437xf32>
    %174 = vector.broadcast %172 : f32 to vector<2x437xf32>
    %175 = arith.mulf %174, %173 : vector<2x437xf32>
    %c33 = arith.constant 33 : index
    %176 = memref.load %arg0[%c33] : memref<36xf32, #tpu.memory_space<smem>>
    %177 = vector.extract_strided_slice %3 {offsets = [4, 0], sizes = [2, 437], strides = [1, 1]} : vector<6x437xf32> to vector<2x437xf32>
    %178 = vector.broadcast %176 : f32 to vector<2x437xf32>
    %179 = arith.mulf %178, %177 : vector<2x437xf32>
    %180 = arith.addf %175, %179 : vector<2x437xf32>
    %c34 = arith.constant 34 : index
    %181 = memref.load %arg0[%c34] : memref<36xf32, #tpu.memory_space<smem>>
    %182 = vector.extract_strided_slice %4 {offsets = [4, 0], sizes = [2, 437], strides = [1, 1]} : vector<6x437xf32> to vector<2x437xf32>
    %183 = vector.broadcast %181 : f32 to vector<2x437xf32>
    %184 = arith.mulf %183, %182 : vector<2x437xf32>
    %c35 = arith.constant 35 : index
    %185 = memref.load %arg0[%c35] : memref<36xf32, #tpu.memory_space<smem>>
    %186 = vector.extract_strided_slice %5 {offsets = [4, 0], sizes = [2, 437], strides = [1, 1]} : vector<6x437xf32> to vector<2x437xf32>
    %187 = vector.broadcast %185 : f32 to vector<2x437xf32>
    %188 = arith.mulf %187, %186 : vector<2x437xf32>
    %189 = arith.addf %184, %188 : vector<2x437xf32>
    %190 = arith.addf %180, %189 : vector<2x437xf32>
    %191 = arith.addf %152, %171 : vector<2x437xf32>
    %c2_6 = arith.constant 2 : index
    %192 = memref.load %arg1[%c2_6] : memref<3xf32, #tpu.memory_space<smem>>
    %193 = vector.broadcast %192 : f32 to vector<2x437xf32>
    %194 = arith.addf %190, %193 : vector<2x437xf32>
    %195 = arith.addf %191, %194 : vector<2x437xf32>
    %196 = vector.broadcast %1 : vector<1x437xf32> to vector<2x437xf32>
    %197 = arith.mulf %195, %196 : vector<2x437xf32>
    %198 = tpu.concatenate %69, %133, %197 in 0 : vector<2x437xf32>, vector<2x437xf32>, vector<2x437xf32> -> vector<6x437xf32>
    %199 = vector.extract_strided_slice %198 {offsets = [0, 0], sizes = [6, 384], strides = [1, 1]} : vector<6x437xf32> to vector<6x384xf32>
    %200 = vector.extract_strided_slice %198 {offsets = [0, 2], sizes = [6, 384], strides = [1, 1]} : vector<6x437xf32> to vector<6x384xf32>
    %201 = vector.extract_strided_slice %198 {offsets = [0, 51], sizes = [6, 384], strides = [1, 1]} : vector<6x437xf32> to vector<6x384xf32>
    %202 = vector.extract_strided_slice %198 {offsets = [0, 53], sizes = [6, 384], strides = [1, 1]} : vector<6x437xf32> to vector<6x384xf32>
    %c0_7 = arith.constant 0 : index
    %203 = memref.load %arg2[%c0_7] : memref<36xf32, #tpu.memory_space<smem>>
    %204 = vector.extract_strided_slice %199 {offsets = [0, 0], sizes = [2, 384], strides = [1, 1]} : vector<6x384xf32> to vector<2x384xf32>
    %205 = vector.broadcast %203 : f32 to vector<2x384xf32>
    %206 = arith.mulf %205, %204 : vector<2x384xf32>
    %c1_8 = arith.constant 1 : index
    %207 = memref.load %arg2[%c1_8] : memref<36xf32, #tpu.memory_space<smem>>
    %208 = vector.extract_strided_slice %200 {offsets = [0, 0], sizes = [2, 384], strides = [1, 1]} : vector<6x384xf32> to vector<2x384xf32>
    %209 = vector.broadcast %207 : f32 to vector<2x384xf32>
    %210 = arith.mulf %209, %208 : vector<2x384xf32>
    %211 = arith.addf %206, %210 : vector<2x384xf32>
    %c2_9 = arith.constant 2 : index
    %212 = memref.load %arg2[%c2_9] : memref<36xf32, #tpu.memory_space<smem>>
    %213 = vector.extract_strided_slice %201 {offsets = [0, 0], sizes = [2, 384], strides = [1, 1]} : vector<6x384xf32> to vector<2x384xf32>
    %214 = vector.broadcast %212 : f32 to vector<2x384xf32>
    %215 = arith.mulf %214, %213 : vector<2x384xf32>
    %c3_10 = arith.constant 3 : index
    %216 = memref.load %arg2[%c3_10] : memref<36xf32, #tpu.memory_space<smem>>
    %217 = vector.extract_strided_slice %202 {offsets = [0, 0], sizes = [2, 384], strides = [1, 1]} : vector<6x384xf32> to vector<2x384xf32>
    %218 = vector.broadcast %216 : f32 to vector<2x384xf32>
    %219 = arith.mulf %218, %217 : vector<2x384xf32>
    %220 = arith.addf %215, %219 : vector<2x384xf32>
    %221 = arith.addf %211, %220 : vector<2x384xf32>
    %c4_11 = arith.constant 4 : index
    %222 = memref.load %arg2[%c4_11] : memref<36xf32, #tpu.memory_space<smem>>
    %223 = vector.extract_strided_slice %199 {offsets = [2, 0], sizes = [2, 384], strides = [1, 1]} : vector<6x384xf32> to vector<2x384xf32>
    %224 = vector.broadcast %222 : f32 to vector<2x384xf32>
    %225 = arith.mulf %224, %223 : vector<2x384xf32>
    %c5_12 = arith.constant 5 : index
    %226 = memref.load %arg2[%c5_12] : memref<36xf32, #tpu.memory_space<smem>>
    %227 = vector.extract_strided_slice %200 {offsets = [2, 0], sizes = [2, 384], strides = [1, 1]} : vector<6x384xf32> to vector<2x384xf32>
    %228 = vector.broadcast %226 : f32 to vector<2x384xf32>
    %229 = arith.mulf %228, %227 : vector<2x384xf32>
    %230 = arith.addf %225, %229 : vector<2x384xf32>
    %c6_13 = arith.constant 6 : index
    %231 = memref.load %arg2[%c6_13] : memref<36xf32, #tpu.memory_space<smem>>
    %232 = vector.extract_strided_slice %201 {offsets = [2, 0], sizes = [2, 384], strides = [1, 1]} : vector<6x384xf32> to vector<2x384xf32>
    %233 = vector.broadcast %231 : f32 to vector<2x384xf32>
    %234 = arith.mulf %233, %232 : vector<2x384xf32>
    %c7_14 = arith.constant 7 : index
    %235 = memref.load %arg2[%c7_14] : memref<36xf32, #tpu.memory_space<smem>>
    %236 = vector.extract_strided_slice %202 {offsets = [2, 0], sizes = [2, 384], strides = [1, 1]} : vector<6x384xf32> to vector<2x384xf32>
    %237 = vector.broadcast %235 : f32 to vector<2x384xf32>
    %238 = arith.mulf %237, %236 : vector<2x384xf32>
    %239 = arith.addf %234, %238 : vector<2x384xf32>
    %240 = arith.addf %230, %239 : vector<2x384xf32>
    %c8_15 = arith.constant 8 : index
    %241 = memref.load %arg2[%c8_15] : memref<36xf32, #tpu.memory_space<smem>>
    %242 = vector.extract_strided_slice %199 {offsets = [4, 0], sizes = [2, 384], strides = [1, 1]} : vector<6x384xf32> to vector<2x384xf32>
    %243 = vector.broadcast %241 : f32 to vector<2x384xf32>
    %244 = arith.mulf %243, %242 : vector<2x384xf32>
    %c9_16 = arith.constant 9 : index
    %245 = memref.load %arg2[%c9_16] : memref<36xf32, #tpu.memory_space<smem>>
    %246 = vector.extract_strided_slice %200 {offsets = [4, 0], sizes = [2, 384], strides = [1, 1]} : vector<6x384xf32> to vector<2x384xf32>
    %247 = vector.broadcast %245 : f32 to vector<2x384xf32>
    %248 = arith.mulf %247, %246 : vector<2x384xf32>
    %249 = arith.addf %244, %248 : vector<2x384xf32>
    %c10_17 = arith.constant 10 : index
    %250 = memref.load %arg2[%c10_17] : memref<36xf32, #tpu.memory_space<smem>>
    %251 = vector.extract_strided_slice %201 {offsets = [4, 0], sizes = [2, 384], strides = [1, 1]} : vector<6x384xf32> to vector<2x384xf32>
    %252 = vector.broadcast %250 : f32 to vector<2x384xf32>
    %253 = arith.mulf %252, %251 : vector<2x384xf32>
    %c11_18 = arith.constant 11 : index
    %254 = memref.load %arg2[%c11_18] : memref<36xf32, #tpu.memory_space<smem>>
    %255 = vector.extract_strided_slice %202 {offsets = [4, 0], sizes = [2, 384], strides = [1, 1]} : vector<6x384xf32> to vector<2x384xf32>
    %256 = vector.broadcast %254 : f32 to vector<2x384xf32>
    %257 = arith.mulf %256, %255 : vector<2x384xf32>
    %258 = arith.addf %253, %257 : vector<2x384xf32>
    %259 = arith.addf %249, %258 : vector<2x384xf32>
    %260 = arith.addf %221, %240 : vector<2x384xf32>
    %c0_19 = arith.constant 0 : index
    %261 = memref.load %arg3[%c0_19] : memref<3xf32, #tpu.memory_space<smem>>
    %262 = vector.broadcast %261 : f32 to vector<2x384xf32>
    %263 = arith.addf %259, %262 : vector<2x384xf32>
    %264 = arith.addf %260, %263 : vector<2x384xf32>
    %c0_20 = arith.constant 0 : index
    %c0_21 = arith.constant 0 : index
    %c0_22 = arith.constant 0 : index
    %265 = vector.load %arg6[%c0_20, %c0_21, %c0_22] : memref<3x2x384xf32, #tpu.memory_space<vmem>>, vector<1x2x384xf32>
    %266 = vector.shape_cast %265 : vector<1x2x384xf32> to vector<2x384xf32>
    %267 = vector.shape_cast %264 : vector<2x384xf32> to vector<1x2x384xf32>
    tpu.vector_store %arg6[%c0_20, %c0_21, %c0_22], %267 {strides = array<i32>} : memref<3x2x384xf32, #tpu.memory_space<vmem>>, vector<1x2x384xf32>,
    %c12_23 = arith.constant 12 : index
    %268 = memref.load %arg2[%c12_23] : memref<36xf32, #tpu.memory_space<smem>>
    %269 = vector.extract_strided_slice %199 {offsets = [0, 0], sizes = [2, 384], strides = [1, 1]} : vector<6x384xf32> to vector<2x384xf32>
    %270 = vector.broadcast %268 : f32 to vector<2x384xf32>
    %271 = arith.mulf %270, %269 : vector<2x384xf32>
    %c13_24 = arith.constant 13 : index
    %272 = memref.load %arg2[%c13_24] : memref<36xf32, #tpu.memory_space<smem>>
    %273 = vector.extract_strided_slice %200 {offsets = [0, 0], sizes = [2, 384], strides = [1, 1]} : vector<6x384xf32> to vector<2x384xf32>
    %274 = vector.broadcast %272 : f32 to vector<2x384xf32>
    %275 = arith.mulf %274, %273 : vector<2x384xf32>
    %276 = arith.addf %271, %275 : vector<2x384xf32>
    %c14_25 = arith.constant 14 : index
    %277 = memref.load %arg2[%c14_25] : memref<36xf32, #tpu.memory_space<smem>>
    %278 = vector.extract_strided_slice %201 {offsets = [0, 0], sizes = [2, 384], strides = [1, 1]} : vector<6x384xf32> to vector<2x384xf32>
    %279 = vector.broadcast %277 : f32 to vector<2x384xf32>
    %280 = arith.mulf %279, %278 : vector<2x384xf32>
    %c15_26 = arith.constant 15 : index
    %281 = memref.load %arg2[%c15_26] : memref<36xf32, #tpu.memory_space<smem>>
    %282 = vector.extract_strided_slice %202 {offsets = [0, 0], sizes = [2, 384], strides = [1, 1]} : vector<6x384xf32> to vector<2x384xf32>
    %283 = vector.broadcast %281 : f32 to vector<2x384xf32>
    %284 = arith.mulf %283, %282 : vector<2x384xf32>
    %285 = arith.addf %280, %284 : vector<2x384xf32>
    %286 = arith.addf %276, %285 : vector<2x384xf32>
    %c16_27 = arith.constant 16 : index
    %287 = memref.load %arg2[%c16_27] : memref<36xf32, #tpu.memory_space<smem>>
    %288 = vector.extract_strided_slice %199 {offsets = [2, 0], sizes = [2, 384], strides = [1, 1]} : vector<6x384xf32> to vector<2x384xf32>
    %289 = vector.broadcast %287 : f32 to vector<2x384xf32>
    %290 = arith.mulf %289, %288 : vector<2x384xf32>
    %c17_28 = arith.constant 17 : index
    %291 = memref.load %arg2[%c17_28] : memref<36xf32, #tpu.memory_space<smem>>
    %292 = vector.extract_strided_slice %200 {offsets = [2, 0], sizes = [2, 384], strides = [1, 1]} : vector<6x384xf32> to vector<2x384xf32>
    %293 = vector.broadcast %291 : f32 to vector<2x384xf32>
    %294 = arith.mulf %293, %292 : vector<2x384xf32>
    %295 = arith.addf %290, %294 : vector<2x384xf32>
    %c18_29 = arith.constant 18 : index
    %296 = memref.load %arg2[%c18_29] : memref<36xf32, #tpu.memory_space<smem>>
    %297 = vector.extract_strided_slice %201 {offsets = [2, 0], sizes = [2, 384], strides = [1, 1]} : vector<6x384xf32> to vector<2x384xf32>
    %298 = vector.broadcast %296 : f32 to vector<2x384xf32>
    %299 = arith.mulf %298, %297 : vector<2x384xf32>
    %c19_30 = arith.constant 19 : index
    %300 = memref.load %arg2[%c19_30] : memref<36xf32, #tpu.memory_space<smem>>
    %301 = vector.extract_strided_slice %202 {offsets = [2, 0], sizes = [2, 384], strides = [1, 1]} : vector<6x384xf32> to vector<2x384xf32>
    %302 = vector.broadcast %300 : f32 to vector<2x384xf32>
    %303 = arith.mulf %302, %301 : vector<2x384xf32>
    %304 = arith.addf %299, %303 : vector<2x384xf32>
    %305 = arith.addf %295, %304 : vector<2x384xf32>
    %c20_31 = arith.constant 20 : index
    %306 = memref.load %arg2[%c20_31] : memref<36xf32, #tpu.memory_space<smem>>
    %307 = vector.extract_strided_slice %199 {offsets = [4, 0], sizes = [2, 384], strides = [1, 1]} : vector<6x384xf32> to vector<2x384xf32>
    %308 = vector.broadcast %306 : f32 to vector<2x384xf32>
    %309 = arith.mulf %308, %307 : vector<2x384xf32>
    %c21_32 = arith.constant 21 : index
    %310 = memref.load %arg2[%c21_32] : memref<36xf32, #tpu.memory_space<smem>>
    %311 = vector.extract_strided_slice %200 {offsets = [4, 0], sizes = [2, 384], strides = [1, 1]} : vector<6x384xf32> to vector<2x384xf32>
    %312 = vector.broadcast %310 : f32 to vector<2x384xf32>
    %313 = arith.mulf %312, %311 : vector<2x384xf32>
    %314 = arith.addf %309, %313 : vector<2x384xf32>
    %c22_33 = arith.constant 22 : index
    %315 = memref.load %arg2[%c22_33] : memref<36xf32, #tpu.memory_space<smem>>
    %316 = vector.extract_strided_slice %201 {offsets = [4, 0], sizes = [2, 384], strides = [1, 1]} : vector<6x384xf32> to vector<2x384xf32>
    %317 = vector.broadcast %315 : f32 to vector<2x384xf32>
    %318 = arith.mulf %317, %316 : vector<2x384xf32>
    %c23_34 = arith.constant 23 : index
    %319 = memref.load %arg2[%c23_34] : memref<36xf32, #tpu.memory_space<smem>>
    %320 = vector.extract_strided_slice %202 {offsets = [4, 0], sizes = [2, 384], strides = [1, 1]} : vector<6x384xf32> to vector<2x384xf32>
    %321 = vector.broadcast %319 : f32 to vector<2x384xf32>
    %322 = arith.mulf %321, %320 : vector<2x384xf32>
    %323 = arith.addf %318, %322 : vector<2x384xf32>
    %324 = arith.addf %314, %323 : vector<2x384xf32>
    %325 = arith.addf %286, %305 : vector<2x384xf32>
    %c1_35 = arith.constant 1 : index
    %326 = memref.load %arg3[%c1_35] : memref<3xf32, #tpu.memory_space<smem>>
    %327 = vector.broadcast %326 : f32 to vector<2x384xf32>
    %328 = arith.addf %324, %327 : vector<2x384xf32>
    %329 = arith.addf %325, %328 : vector<2x384xf32>
    %c1_36 = arith.constant 1 : index
    %c0_37 = arith.constant 0 : index
    %c0_38 = arith.constant 0 : index
    %330 = vector.load %arg6[%c1_36, %c0_37, %c0_38] : memref<3x2x384xf32, #tpu.memory_space<vmem>>, vector<1x2x384xf32>
    %331 = vector.shape_cast %330 : vector<1x2x384xf32> to vector<2x384xf32>
    %332 = vector.shape_cast %329 : vector<2x384xf32> to vector<1x2x384xf32>
    tpu.vector_store %arg6[%c1_36, %c0_37, %c0_38], %332 {strides = array<i32>} : memref<3x2x384xf32, #tpu.memory_space<vmem>>, vector<1x2x384xf32>,
    %c24_39 = arith.constant 24 : index
    %333 = memref.load %arg2[%c24_39] : memref<36xf32, #tpu.memory_space<smem>>
    %334 = vector.extract_strided_slice %199 {offsets = [0, 0], sizes = [2, 384], strides = [1, 1]} : vector<6x384xf32> to vector<2x384xf32>
    %335 = vector.broadcast %333 : f32 to vector<2x384xf32>
    %336 = arith.mulf %335, %334 : vector<2x384xf32>
    %c25_40 = arith.constant 25 : index
    %337 = memref.load %arg2[%c25_40] : memref<36xf32, #tpu.memory_space<smem>>
    %338 = vector.extract_strided_slice %200 {offsets = [0, 0], sizes = [2, 384], strides = [1, 1]} : vector<6x384xf32> to vector<2x384xf32>
    %339 = vector.broadcast %337 : f32 to vector<2x384xf32>
    %340 = arith.mulf %339, %338 : vector<2x384xf32>
    %341 = arith.addf %336, %340 : vector<2x384xf32>
    %c26_41 = arith.constant 26 : index
    %342 = memref.load %arg2[%c26_41] : memref<36xf32, #tpu.memory_space<smem>>
    %343 = vector.extract_strided_slice %201 {offsets = [0, 0], sizes = [2, 384], strides = [1, 1]} : vector<6x384xf32> to vector<2x384xf32>
    %344 = vector.broadcast %342 : f32 to vector<2x384xf32>
    %345 = arith.mulf %344, %343 : vector<2x384xf32>
    %c27_42 = arith.constant 27 : index
    %346 = memref.load %arg2[%c27_42] : memref<36xf32, #tpu.memory_space<smem>>
    %347 = vector.extract_strided_slice %202 {offsets = [0, 0], sizes = [2, 384], strides = [1, 1]} : vector<6x384xf32> to vector<2x384xf32>
    %348 = vector.broadcast %346 : f32 to vector<2x384xf32>
    %349 = arith.mulf %348, %347 : vector<2x384xf32>
    %350 = arith.addf %345, %349 : vector<2x384xf32>
    %351 = arith.addf %341, %350 : vector<2x384xf32>
    %c28_43 = arith.constant 28 : index
    %352 = memref.load %arg2[%c28_43] : memref<36xf32, #tpu.memory_space<smem>>
    %353 = vector.extract_strided_slice %199 {offsets = [2, 0], sizes = [2, 384], strides = [1, 1]} : vector<6x384xf32> to vector<2x384xf32>
    %354 = vector.broadcast %352 : f32 to vector<2x384xf32>
    %355 = arith.mulf %354, %353 : vector<2x384xf32>
    %c29_44 = arith.constant 29 : index
    %356 = memref.load %arg2[%c29_44] : memref<36xf32, #tpu.memory_space<smem>>
    %357 = vector.extract_strided_slice %200 {offsets = [2, 0], sizes = [2, 384], strides = [1, 1]} : vector<6x384xf32> to vector<2x384xf32>
    %358 = vector.broadcast %356 : f32 to vector<2x384xf32>
    %359 = arith.mulf %358, %357 : vector<2x384xf32>
    %360 = arith.addf %355, %359 : vector<2x384xf32>
    %c30_45 = arith.constant 30 : index
    %361 = memref.load %arg2[%c30_45] : memref<36xf32, #tpu.memory_space<smem>>
    %362 = vector.extract_strided_slice %201 {offsets = [2, 0], sizes = [2, 384], strides = [1, 1]} : vector<6x384xf32> to vector<2x384xf32>
    %363 = vector.broadcast %361 : f32 to vector<2x384xf32>
    %364 = arith.mulf %363, %362 : vector<2x384xf32>
    %c31_46 = arith.constant 31 : index
    %365 = memref.load %arg2[%c31_46] : memref<36xf32, #tpu.memory_space<smem>>
    %366 = vector.extract_strided_slice %202 {offsets = [2, 0], sizes = [2, 384], strides = [1, 1]} : vector<6x384xf32> to vector<2x384xf32>
    %367 = vector.broadcast %365 : f32 to vector<2x384xf32>
    %368 = arith.mulf %367, %366 : vector<2x384xf32>
    %369 = arith.addf %364, %368 : vector<2x384xf32>
    %370 = arith.addf %360, %369 : vector<2x384xf32>
    %c32_47 = arith.constant 32 : index
    %371 = memref.load %arg2[%c32_47] : memref<36xf32, #tpu.memory_space<smem>>
    %372 = vector.extract_strided_slice %199 {offsets = [4, 0], sizes = [2, 384], strides = [1, 1]} : vector<6x384xf32> to vector<2x384xf32>
    %373 = vector.broadcast %371 : f32 to vector<2x384xf32>
    %374 = arith.mulf %373, %372 : vector<2x384xf32>
    %c33_48 = arith.constant 33 : index
    %375 = memref.load %arg2[%c33_48] : memref<36xf32, #tpu.memory_space<smem>>
    %376 = vector.extract_strided_slice %200 {offsets = [4, 0], sizes = [2, 384], strides = [1, 1]} : vector<6x384xf32> to vector<2x384xf32>
    %377 = vector.broadcast %375 : f32 to vector<2x384xf32>
    %378 = arith.mulf %377, %376 : vector<2x384xf32>
    %379 = arith.addf %374, %378 : vector<2x384xf32>
    %c34_49 = arith.constant 34 : index
    %380 = memref.load %arg2[%c34_49] : memref<36xf32, #tpu.memory_space<smem>>
    %381 = vector.extract_strided_slice %201 {offsets = [4, 0], sizes = [2, 384], strides = [1, 1]} : vector<6x384xf32> to vector<2x384xf32>
    %382 = vector.broadcast %380 : f32 to vector<2x384xf32>
    %383 = arith.mulf %382, %381 : vector<2x384xf32>
    %c35_50 = arith.constant 35 : index
    %384 = memref.load %arg2[%c35_50] : memref<36xf32, #tpu.memory_space<smem>>
    %385 = vector.extract_strided_slice %202 {offsets = [4, 0], sizes = [2, 384], strides = [1, 1]} : vector<6x384xf32> to vector<2x384xf32>
    %386 = vector.broadcast %384 : f32 to vector<2x384xf32>
    %387 = arith.mulf %386, %385 : vector<2x384xf32>
    %388 = arith.addf %383, %387 : vector<2x384xf32>
    %389 = arith.addf %379, %388 : vector<2x384xf32>
    %390 = arith.addf %351, %370 : vector<2x384xf32>
    %c2_51 = arith.constant 2 : index
    %391 = memref.load %arg3[%c2_51] : memref<3xf32, #tpu.memory_space<smem>>
    %392 = vector.broadcast %391 : f32 to vector<2x384xf32>
    %393 = arith.addf %389, %392 : vector<2x384xf32>
    %394 = arith.addf %390, %393 : vector<2x384xf32>
    %c2_52 = arith.constant 2 : index
    %c0_53 = arith.constant 0 : index
    %c0_54 = arith.constant 0 : index
    %395 = vector.load %arg6[%c2_52, %c0_53, %c0_54] : memref<3x2x384xf32, #tpu.memory_space<vmem>>, vector<1x2x384xf32>
    %396 = vector.shape_cast %395 : vector<1x2x384xf32> to vector<2x384xf32>
    %397 = vector.shape_cast %394 : vector<2x384xf32> to vector<1x2x384xf32>
    tpu.vector_store %arg6[%c2_52, %c0_53, %c0_54], %397 {strides = array<i32>} : memref<3x2x384xf32, #tpu.memory_space<vmem>>, vector<1x2x384xf32>,
    return
  }
}

</mosaic_0001>

<bundles_post_ra>
// kernel: tpu_custom_call.1
= control target key start
LH: loop header
LB: loop body
LE: loop exit
PB: predicated region body
PF: predicated region fallthrough
CT: control target
= control target key end

     0   :  { %11 = vsyncpa [#allocation5], 0  ;;  %s3762_s0 = inlined_call_operand.hbm [shape: f32[36], index: 0, kind: input, shape index: {}]   ;;  %s3763_s1 = inlined_call_operand.vmem [shape: f32[3], index: 1, kind: input, shape index: {}]   ;;  %s3764_s2 = inlined_call_operand.vmem [shape: f32[36], index: 2, kind: input, shape index: {}]   ;;  %s3765_s3 = inlined_call_operand.vmem [shape: f32[3], index: 3, kind: input, shape index: {}]   ;;  %s3766_s4 = inlined_call_operand.hbm [shape: f32[6,512], index: 4, kind: input, shape index: {}]   ;;  %s3767_s5 = inlined_call_operand.vmem [shape: f32[1,437], index: 5, kind: input, shape index: {}]   ;;  %s3768_s6 = inlined_call_operand.hbm [shape: f32[3,2,384], index: 6, kind: output, shape index: {}]  }
   0x1   :  { %12 = vsyncpa [#allocation6], 0 }
   0x2   :  { %13 = vsyncpa [#allocation9], 0 }
   0x3   :  { %14 = vsyncpa [#allocation3], 0  ;;  %s40_s23 = sshll.u32 %s3764_s2, 4  ;;  %s41_s23 = int_to_ptr.vmem [resolvable:$true] %s40_s23 }
   0x4   :  { %15 = vsyncpa [#allocation4], 0  ;;  %s2164_s24 = scalar_lea.vmem %s41_s23, 16  ;;  %p2169_p1 = scmp.lt.s32.totalorder %s41_s23, %s41_s23 }
   0x5   :  { %p2165_p0 = scmp.ne.s32.totalorder %s41_s23, %s2164_s24  ;;  %p2170_p2 = scmp.lt.s32.totalorder %s2164_s24, %s2164_s24 }
   0x7   :  { %p2171_p3 = por %p2170_p2, %p2169_p1 }
   0x9   :  { %p2172_p4 = pnand %p2171_p3, %p2165_p0 }
   0xb   :  { %2175 = shalt.err (!%p2172_p4)
}
   0xc   :  { %s2264_s25 = smov [#allocation8]   ;;  %s2176_s28 = scalar_lea.hbm %s3762_s0, 16 }
   0xd   :  { %43 = dma.vmem_to_smem %s41_s23, 16, %s2264_s25, [#allocation9]  }
   0xe   :  { %p2177_p5 = scmp.ne.s32.totalorder %s3762_s0, %s2176_s28  ;;  %p2180_p6 = scmp.lt.u32.totalorder %s2176_s28, %s3762_s0 }
  0x10   :  { %p2182_p7 = pnand %p2180_p6, %p2177_p5 }
  0x12   :  { %2185 = shalt.err (!%p2182_p7)
}
  0x13   :  { %s2265_s8 = smov [#allocation2]   ;;  %s30_s13 = sshll.u32 %s3763_s1, 4  ;;  %s31_s13 = int_to_ptr.vmem [resolvable:$true] %s30_s13 }
  0x14   :  { %23 = dma.hbm_to_smem %s3762_s0, 16, %s2265_s8, [#allocation5]  }
  0x15   :  { %s50_s16 = sshll.u32 %s3765_s3, 4  ;;  %s2186_s17 = scalar_lea.vmem %s31_s13, 16  ;;  %s51_s16 = int_to_ptr.vmem [resolvable:$true] %s50_s16 }
  0x16   :  { %p2187_p8 = scmp.ne.s32.totalorder %s31_s13, %s2186_s17  ;;  %p2191_p9 = scmp.lt.s32.totalorder %s31_s13, %s31_s13 }
  0x17   :  { %p2192_p10 = scmp.lt.s32.totalorder %s2186_s17, %s2186_s17 }
  0x19   :  { %p2193_p11 = por %p2192_p10, %p2191_p9 }
  0x1b   :  { %p2194_p12 = pnand %p2193_p11, %p2187_p8 }
  0x1d   :  { %2197 = shalt.err (!%p2194_p12)
}
  0x1e   :  { %s2266_s18 = smov [#allocation7]   ;;  %s2198_s0 = scalar_lea.vmem %s51_s16, 16 }
  0x1f   :  { %33 = dma.vmem_to_smem %s31_s13, 16, %s2266_s18, [#allocation6]  }
  0x20   :  { %p2199_p13 = scmp.ne.s32.totalorder %s51_s16, %s2198_s0  ;;  %p2203_p0 = scmp.lt.s32.totalorder %s51_s16, %s51_s16 }
  0x21   :  { %p2204_p1 = scmp.lt.s32.totalorder %s2198_s0, %s2198_s0 }
  0x23   :  { %p2205_p2 = por %p2204_p1, %p2203_p0 }
  0x25   :  { %p2206_p3 = pnand %p2205_p2, %p2199_p13 }
  0x27   :  { %2209 = shalt.err (!%p2206_p3)
}
  0x28   :  { %s2267_s1 = smov [#allocation10]   ;;  %s2268_s3 = smov [#allocation11]  }
  0x29   :  { %53 = dma.vmem_to_smem %s51_s16, 16, %s2267_s1, [#allocation9]  }
  0x2a   :  { %s60_s19 = sshll.u32 %s2268_s3, 4  ;;  %s2210_s22 = scalar_lea.hbm %s3766_s4, 512  ;;  %s61_s19 = int_to_ptr.vmem [resolvable:$true] %s60_s19 }
  0x2b   :  { %p2211_p4 = scmp.ne.s32.totalorder %s3766_s4, %s2210_s22  ;;  %p2214_p5 = scmp.lt.u32.totalorder %s2210_s22, %s3766_s4 }
  0x2d   :  { %p2216_p6 = pnand %p2214_p5, %p2211_p4 }
  0x2f   :  { %2219 = shalt.err (!%p2216_p6)
}
  0x30   :  { %s2220_s27 = scalar_lea.vmem %s61_s19, 512  ;;  %p2225_p8 = scmp.lt.s32.totalorder %s61_s19, %s61_s19 }
  0x31   :  { %p2221_p7 = scmp.ne.s32.totalorder %s61_s19, %s2220_s27  ;;  %p2226_p9 = scmp.lt.s32.totalorder %s2220_s27, %s2220_s27 }
  0x33   :  { %p2227_p10 = por %p2226_p9, %p2225_p8 }
  0x35   :  { %p2228_p11 = pnand %p2227_p10, %p2221_p7 }
  0x37   :  { %2231 = shalt.err (!%p2228_p11)
}
  0x38   :  { %63 = dma.hbm_to_vmem [thread:$0]  %s3766_s4, 512, %s61_s19, [#allocation3]  }
  0x39   :  { %2254 = dma.done.wait [#allocation5], 16  }
  0x3a   :  { %2255 = vsyncadd [#allocation5], 4294967280 }
  0x3b   :  { %2256 = dma.done.wait [#allocation6], 16  }
  0x3c   :  { %2257 = vsyncadd [#allocation6], 4294967280 }
  0x3d   :  { %2258 = dma.done.wait [#allocation9], 32  }
  0x3e   :  { %2259 = vsyncadd [#allocation9], 4294967264 }
  0x3f   :  { %2260 = dma.done.wait [#allocation3], 512  }
  0x40   :  { %2261 = vsyncadd [#allocation3], 4294966784 }
  0x41   :  { %81 = sfence }
  0x42   :  { %s2073_s30 = sld [smem:[#allocation2 + $0x1]]  ;;  %s2075_s2 = sld [smem:[#allocation2 + $0x3]]  ;;  %v2345_v0 = vld [vmem:[#allocation11 + $0x10] sm:$0x3f]  ;;  %v2347_v1 = vld [vmem:[#allocation11] sm:$0x3f] }
  0x43   :  { %v2349_v3 = vld [vmem:[#allocation11 + $0x18] sm:$0x3f]  ;;  %v2351_v4 = vld [vmem:[#allocation11 + $0x8] sm:$0x3f]  ;;  %s2269_s4 = smov 127   ;;  %s2077_s7 = sld [smem:[#allocation2 + $0x5]] }
  0x44   :  { %s2079_s8 = sld [smem:[#allocation2 + $0x7]]  ;;  %s2081_s9 = sld [smem:[#allocation2 + $0x9]]  ;;  %vm111_vm0 = vcmask 1039360   ;;  %vm170_vm1 = vcmask 908288   ;;  %vm1097_vm2 = vcmask 1041408   ;;  %vm1102_vm3 = vcmask 1043456  }
  0x45   :  { %s2083_s10 = sld [smem:[#allocation2 + $0xb]]  ;;  %s2085_s11 = sld [smem:[#allocation2 + $0xd]]  ;;  %vm1130_vm4 = vcmask 1031168   ;;  %vm1187_vm5 = vcmask 629760  }
  0x46   :  { %s2087_s12 = sld [smem:[#allocation2 + $0xf]]  ;;  %s2089_s13 = sld [smem:[#allocation2 + $0x11]] }
  0x47   :  { %s2091_s14 = sld [smem:[#allocation2 + $0x13]]  ;;  %s2093_s15 = sld [smem:[#allocation2 + $0x15]] }
  0x48   :  { %v94_v2 = vstv %s2073_s30  ;;  %v130_v9 = vstv %s2075_s2  ;;  %s2074_s16 = sld [smem:[#allocation2 + $0x2]]  ;;  %s2078_s17 = sld [smem:[#allocation2 + $0x6]] }
  0x49   :  { %v97_v5 = vmul.f32 %v94_v2, %v2345_v0  ;;  %v95_v6 = vmul.f32 %v94_v2, %v2347_v1  ;;  %v98_v7 = vmul.f32 %v94_v2, %v2349_v3  ;;  %v96_v8 = vmul.f32 %v94_v2, %v2351_v4  ;;  %s2270_s18 = smov 111   ;;  %s2082_s0 = sld [smem:[#allocation2 + $0xa]] }
  0x4a   :  { %v132_v10 = vmul.f32 %v130_v9, %v2351_v4  ;;  %v131_v11 = vmul.f32 %v130_v9, %v2347_v1  ;;  %v134_v12 = vmul.f32 %v130_v9, %v2349_v3  ;;  %v133_v13 = vmul.f32 %v130_v9, %v2345_v0  ;;  %s2086_s1 = sld [smem:[#allocation2 + $0xe]]  ;;  %s2090_s3 = sld [smem:[#allocation2 + $0x12]] }
  0x4b   :  { %107 = vrot.lane.b32.xlu1 %v97_v5, %s2269_s4  ;;  %103 = vrot.lane.b32.xlu0 %v95_v6, %s2269_s4  ;;  %v189_v14 = vstv %s2077_s7  ;;  %v224_v19 = vstv %s2079_s8  ;;  %s2095_s19 = sld [smem:[#allocation2 + $0x17]]  ;;  %s2094_s20 = sld [smem:[#allocation2 + $0x16]] }
  0x4c   :  { %v191_v15 = vmul.f32 %v189_v14, %v2351_v4  ;;  %v190_v16 = vmul.f32 %v189_v14, %v2347_v1  ;;  %v193_v17 = vmul.f32 %v189_v14, %v2349_v3  ;;  %v192_v18 = vmul.f32 %v189_v14, %v2345_v0  ;;  %s2098_s21 = sld [smem:[#allocation2 + $0x19]]  ;;  %s2100_s22 = sld [smem:[#allocation2 + $0x1b]] }
  0x4d   :  { %v226_v20 = vmul.f32 %v224_v19, %v2351_v4  ;;  %v225_v21 = vmul.f32 %v224_v19, %v2347_v1  ;;  %v228_v22 = vmul.f32 %v224_v19, %v2349_v3  ;;  %v227_v23 = vmul.f32 %v224_v19, %v2345_v0  ;;  %s2104_s23 = sld [smem:[#allocation2 + $0x1f]]  ;;  %s2108_s24 = sld [smem:[#allocation2 + $0x23]] }
  0x4e   :  { %v282_v24 = vstv %s2081_s9  ;;  %v317_v29 = vstv %s2083_s10  ;;  %v438_v34 = vstv %s2085_s11  ;;  %v473_v39 = vstv %s2087_s12  ;;  %s2099_s25 = sld [smem:[#allocation2 + $0x1a]]  ;;  %s2102_s26 = sld [smem:[#allocation2 + $0x1d]] }
  0x4f   :  { %109 = vrot.lane.b32.xlu1 %v98_v7, %s2269_s4  ;;  %105 = vrot.lane.b32.xlu0 %v96_v8, %s2269_s4  ;;  %v284_v25 = vmul.f32 %v282_v24, %v2351_v4  ;;  %v283_v26 = vmul.f32 %v282_v24, %v2347_v1  ;;  %v286_v27 = vmul.f32 %v282_v24, %v2349_v3  ;;  %v531_v44 = vstv %s2089_s13  ;;  %s2103_s27 = sld [smem:[#allocation2 + $0x1e]]  ;;  %s2106_s28 = sld [smem:[#allocation2 + $0x21]] }
  0x50   :  { %v285_v28 = vmul.f32 %v282_v24, %v2345_v0  ;;  %v319_v30 = vmul.f32 %v317_v29, %v2351_v4  ;;  %v318_v31 = vmul.f32 %v317_v29, %v2347_v1  ;;  %v321_v32 = vmul.f32 %v317_v29, %v2349_v3  ;;  %s2107_s29 = sld [smem:[#allocation2 + $0x22]]  ;;  %s87_s30 = sld [smem:[#allocation2]] }
  0x51   :  { %v320_v33 = vmul.f32 %v317_v29, %v2345_v0  ;;  %v440_v35 = vmul.f32 %v438_v34, %v2351_v4  ;;  %v439_v36 = vmul.f32 %v438_v34, %v2347_v1  ;;  %v442_v37 = vmul.f32 %v438_v34, %v2349_v3  ;;  %s2076_s2 = sld [smem:[#allocation2 + $0x4]]  ;;  %s2080_s7 = sld [smem:[#allocation2 + $0x8]] }
  0x52   :  { %v441_v38 = vmul.f32 %v438_v34, %v2345_v0  ;;  %v475_v40 = vmul.f32 %v473_v39, %v2351_v4  ;;  %v474_v41 = vmul.f32 %v473_v39, %v2347_v1  ;;  %v477_v42 = vmul.f32 %v473_v39, %v2349_v3  ;;  %s2088_s8 = sld [smem:[#allocation2 + $0x10]]  ;;  %s2092_s9 = sld [smem:[#allocation2 + $0x14]] }
  0x53   :  { %141 = vrot.lane.b32.xlu1 %v132_v10, %s2269_s4  ;;  %139 = vrot.lane.b32.xlu0 %v131_v11, %s2269_s4  ;;  %v476_v43 = vmul.f32 %v473_v39, %v2345_v0  ;;  %v533_v45 = vmul.f32 %v531_v44, %v2351_v4  ;;  %v532_v46 = vmul.f32 %v531_v44, %v2347_v1  ;;  %v566_v49 = vstv %s2091_s14  ;;  %s2757_s10 = sld [smem:[#allocation7]]  ;;  %s2937_s14 = sld [smem:[#allocation2 + $0x1c]] }
  0x54   :  { %v535_v47 = vmul.f32 %v531_v44, %v2349_v3  ;;  %v534_v48 = vmul.f32 %v531_v44, %v2345_v0  ;;  %v568_v50 = vmul.f32 %v566_v49, %v2351_v4  ;;  %v567_v51 = vmul.f32 %v566_v49, %v2347_v1  ;;  %s2929_s13 = sld [smem:[#allocation2 + $0x18]]  ;;  %s2119_s12 = sld [smem:[#allocation8 + $0xa]] }
  0x55   :  { %v570_v52 = vmul.f32 %v566_v49, %v2349_v3  ;;  %v569_v53 = vmul.f32 %v566_v49, %v2345_v0  ;;  %v624_v54 = vstv %s2093_s15  ;;  %v2445_v61 = vstv %s2074_s16  ;;  %s2958_s15 = sld [smem:[#allocation2 + $0x20]]  ;;  %s3008_s16 = sld [smem:[#allocation7 + $0x2]] }
  0x56   :  { %v625_v55 = vmul.f32 %v624_v54, %v2347_v1  ;;  %v626_v56 = vmul.f32 %v624_v54, %v2351_v4  ;;  %v627_v57 = vmul.f32 %v624_v54, %v2345_v0  ;;  %v628_v58 = vmul.f32 %v624_v54, %v2349_v3  ;;  %s2117_s11 = sld [smem:[#allocation8 + $0x8]] }
  0x57   :  { %145 = vrot.lane.b32.xlu1 %v134_v12, %s2269_s4  ;;  %143 = vrot.lane.b32.xlu0 %v133_v13, %s2269_s4  ;;  %v125_v2 = vmul.f32 %v2445_v61, %v2347_v1  ;;  %v128_v8 = vmul.f32 %v2445_v61, %v2349_v3  ;;  %v127_v10 = vmul.f32 %v2445_v61, %v2345_v0 }
  0x5b   :  { %200 = vrot.lane.b32.xlu1 %v191_v15, %s2269_s4  ;;  %198 = vrot.lane.b32.xlu0 %v190_v16, %s2269_s4 }
  0x5f   :  { %204 = vrot.lane.b32.xlu1 %v193_v17, %s2269_s4  ;;  %202 = vrot.lane.b32.xlu0 %v192_v18, %s2269_s4  ;;  %v2472_v18 = vstv %s2078_s17  ;;  %s3048_s17 = sld [smem:[#allocation8 + $0x1]] }
  0x63   :  { %235 = vrot.lane.b32.xlu1 %v226_v20, %s2269_s4  ;;  %233 = vrot.lane.b32.xlu0 %v225_v21, %s2269_s4  ;;  %v219_v21 = vmul.f32 %v2472_v18, %v2347_v1 }
  0x67   :  { %239 = vrot.lane.b32.xlu1 %v228_v22, %s2269_s4  ;;  %237 = vrot.lane.b32.xlu0 %v227_v23, %s2269_s4 }
  0x6b   :  { %293 = vrot.lane.b32.xlu1 %v284_v25, %s2269_s4  ;;  %291 = vrot.lane.b32.xlu0 %v283_v26, %s2269_s4  ;;  %v222_v25 = vmul.f32 %v2472_v18, %v2349_v3 }
  0x6f   :  { %297 = vrot.lane.b32.xlu1 %v286_v27, %s2269_s4  ;;  %295 = vrot.lane.b32.xlu0 %v285_v28, %s2269_s4  ;;  %v221_v27 = vmul.f32 %v2472_v18, %v2345_v0 }
  0x73   :  { %328 = vrot.lane.b32.xlu1 %v319_v30, %s2269_s4  ;;  %326 = vrot.lane.b32.xlu0 %v318_v31, %s2269_s4 }
  0x77   :  { %332 = vrot.lane.b32.xlu1 %v321_v32, %s2269_s4  ;;  %330 = vrot.lane.b32.xlu0 %v320_v33, %s2269_s4 }
  0x7b   :  { %449 = vrot.lane.b32.xlu1 %v440_v35, %s2269_s4  ;;  %447 = vrot.lane.b32.xlu0 %v439_v36, %s2269_s4  ;;  %v2499_v35 = vstv %s2082_s0  ;;  %s2271_s0 = smov 126  }
  0x7c   :  { %v314_v44 = vmul.f32 %v2499_v35, %v2345_v0 }
  0x7f   :  { %453 = vrot.lane.b32.xlu1 %v442_v37, %s2269_s4  ;;  %451 = vrot.lane.b32.xlu0 %v441_v38, %s2269_s4  ;;  %v312_v38 = vmul.f32 %v2499_v35, %v2347_v1 }
  0x83   :  { %484 = vrot.lane.b32.xlu1 %v475_v40, %s2269_s4  ;;  %482 = vrot.lane.b32.xlu0 %v474_v41, %s2269_s4 }
  0x87   :  { %488 = vrot.lane.b32.xlu1 %v477_v42, %s2269_s4  ;;  %486 = vrot.lane.b32.xlu0 %v476_v43, %s2269_s4  ;;  %v315_v42 = vmul.f32 %v2499_v35, %v2349_v3 }
  0x8b   :  { %542 = vrot.lane.b32.xlu1 %v533_v45, %s2269_s4  ;;  %540 = vrot.lane.b32.xlu0 %v532_v46, %s2269_s4 }
  0x8f   :  { %546 = vrot.lane.b32.xlu1 %v535_v47, %s2269_s4  ;;  %544 = vrot.lane.b32.xlu0 %v534_v48, %s2269_s4 }
  0x93   :  { %577 = vrot.lane.b32.xlu1 %v568_v50, %s2269_s4  ;;  %575 = vrot.lane.b32.xlu0 %v567_v51, %s2269_s4 }
  0x97   :  { %581 = vrot.lane.b32.xlu1 %v570_v52, %s2269_s4  ;;  %579 = vrot.lane.b32.xlu0 %v569_v53, %s2269_s4  ;;  %v467_v52 = vstv %s2086_s1  ;;  %s2114_s1 = sld [smem:[#allocation8 + $0x5]] }
  0x9b   :  { %633 = vrot.lane.b32.xlu0 %v625_v55, %s2269_s4  ;;  %635 = vrot.lane.b32.xlu1 %v626_v56, %s2269_s4  ;;  %v468_v55 = vmul.f32 %v467_v52, %v2347_v1 }
  0x9f   :  { %637 = vrot.lane.b32.xlu0 %v627_v57, %s2269_s4  ;;  %639 = vrot.lane.b32.xlu1 %v628_v58, %s2269_s4 }
  0xbd   :  { %v2441_v59 = vpop.permute.xlu1 %107  ;;  %v2443_v60 = vpop.permute.xlu0 %103 }
  0xc1   :  { %v2447_v62 = vpop.permute.xlu1 %109  ;;  %v2449_v63 = vpop.permute.xlu0 %105 }
  0xc5   :  { %v2453_v5 = vpop.permute.xlu1 %141  ;;  %v140_v6 = vpop.permute.xlu0 %139 }
  0xc6   :  { %v147_v7 = vsel %vm111_vm0, %v140_v6, %v2453_v5 }
  0xc7   :  { %v154_v9 = vadd.f32 %v147_v7, %v125_v2  ;;  %v471_v2 = vmul.f32 %v467_v52, %v2349_v3  ;;  %v470_v7 = vmul.f32 %v467_v52, %v2345_v0 }
  0xc9   :  { %v146_v11 = vpop.permute.xlu1 %145  ;;  %162 = vrot.lane.b32.xlu0 %v154_v9, %s2270_s18  ;;  %v2462_v12 = vpop.permute.xlu0 %143 }
  0xca   :  { %v157_v13 = vadd.f32 %v146_v11, %v128_v8  ;;  %v149_v14 = vsel %vm111_vm0, %v2462_v12, %v146_v11 }
  0xcb   :  { %v156_v15 = vadd.f32 %v149_v14, %v127_v10 }
  0xcc   :  { %168 = vrot.lane.b32.xlu1 %v157_v13, %s2270_s18 }
  0xcd   :  { %v2467_v16 = vpop.permute.xlu1 %200  ;;  %166 = vrot.lane.b32.xlu0 %v156_v15, %s2270_s18  ;;  %v2470_v17 = vpop.permute.xlu0 %198 }
  0xd1   :  { %v2474_v19 = vpop.permute.xlu1 %204  ;;  %v2476_v20 = vpop.permute.xlu0 %202 }
  0xd5   :  { %v2480_v22 = vpop.permute.xlu1 %235  ;;  %v234_v23 = vpop.permute.xlu0 %233 }
  0xd6   :  { %v241_v24 = vsel %vm111_vm0, %v234_v23, %v2480_v22 }
  0xd7   :  { %v248_v26 = vadd.f32 %v241_v24, %v219_v21  ;;  %v560_v21 = vstv %s2090_s3  ;;  %s2116_s3 = sld [smem:[#allocation8 + $0x7]] }
  0xd9   :  { %v240_v28 = vpop.permute.xlu1 %239  ;;  %256 = vrot.lane.b32.xlu0 %v248_v26, %s2270_s18  ;;  %v2489_v29 = vpop.permute.xlu0 %237 }
  0xda   :  { %v251_v30 = vadd.f32 %v240_v28, %v222_v25  ;;  %v243_v31 = vsel %vm111_vm0, %v2489_v29, %v240_v28  ;;  %v561_v25 = vmul.f32 %v560_v21, %v2347_v1 }
  0xdb   :  { %v250_v32 = vadd.f32 %v243_v31, %v221_v27 }
  0xdc   :  { %262 = vrot.lane.b32.xlu1 %v251_v30, %s2270_s18  ;;  %v564_v30 = vmul.f32 %v560_v21, %v2349_v3 }
  0xdd   :  { %v2494_v33 = vpop.permute.xlu1 %293  ;;  %260 = vrot.lane.b32.xlu0 %v250_v32, %s2270_s18  ;;  %v2497_v34 = vpop.permute.xlu0 %291  ;;  %v563_v32 = vmul.f32 %v560_v21, %v2345_v0 }
  0xe1   :  { %v2501_v36 = vpop.permute.xlu1 %297  ;;  %v2503_v37 = vpop.permute.xlu0 %295 }
  0xe5   :  { %v2507_v39 = vpop.permute.xlu1 %328  ;;  %v327_v40 = vpop.permute.xlu0 %326 }
  0xe6   :  { %v334_v41 = vsel %vm111_vm0, %v327_v40, %v2507_v39 }
  0xe7   :  { %v341_v43 = vadd.f32 %v334_v41, %v312_v38 }
  0xe9   :  { %v333_v45 = vpop.permute.xlu1 %332  ;;  %349 = vrot.lane.b32.xlu0 %v341_v43, %s2270_s18  ;;  %v331_v46 = vpop.permute.xlu0 %330  ;;  %v126_v43 = vmul.f32 %v2445_v61, %v2351_v4  ;;  %v242_v61 = vsel %vm111_vm0, %v2480_v22, %v2489_v29  ;;  %v469_v22 = vmul.f32 %v467_v52, %v2351_v4 }
  0xea   :  { %v344_v47 = vadd.f32 %v333_v45, %v315_v42  ;;  %v336_v48 = vsel %vm111_vm0, %v331_v46, %v333_v45  ;;  %v148_v45 = vsel %vm111_vm0, %v2453_v5, %v2462_v12 }
  0xeb   :  { %v343_v49 = vadd.f32 %v336_v48, %v314_v44  ;;  %v659_v44 = vstv %s2095_s19  ;;  %s2118_s19 = sld [smem:[#allocation8 + $0x9]] }
  0xec   :  { %355 = vrot.lane.b32.xlu1 %v344_v47, %s2270_s18  ;;  %v660_v48 = vmul.f32 %v659_v44, %v2347_v1  ;;  %v662_v5 = vmul.f32 %v659_v44, %v2345_v0 }
  0xed   :  { %v2518_v50 = vpop.permute.xlu1 %449  ;;  %353 = vrot.lane.b32.xlu0 %v343_v49, %s2270_s18  ;;  %v2521_v51 = vpop.permute.xlu0 %447  ;;  %v155_v49 = vadd.f32 %v148_v45, %v126_v43 }
  0xf1   :  { %v2523_v53 = vpop.permute.xlu1 %453  ;;  %v2525_v54 = vpop.permute.xlu0 %451 }
  0xf5   :  { %v485_v56 = vpop.permute.xlu1 %484  ;;  %v483_v57 = vpop.permute.xlu0 %482 }
  0xf6   :  { %v490_v58 = vsel %vm111_vm0, %v483_v57, %v485_v56  ;;  %v313_v57 = vmul.f32 %v2499_v35, %v2351_v4 }
  0xf7   :  { %v497_v6 = vadd.f32 %v490_v58, %v468_v55  ;;  %v220_v55 = vmul.f32 %v2472_v18, %v2351_v4  ;;  %v335_v58 = vsel %vm111_vm0, %v2507_v39, %v331_v46  ;;  %v661_v39 = vmul.f32 %v659_v44, %v2351_v4 }
  0xf8   :  { %v342_v18 = vadd.f32 %v335_v58, %v313_v57  ;;  %v663_v46 = vmul.f32 %v659_v44, %v2349_v3 }
  0xf9   :  { %v489_v8 = vpop.permute.xlu1 %488  ;;  %505 = vrot.lane.b32.xlu0 %v497_v6, %s2270_s18  ;;  %v487_v9 = vpop.permute.xlu0 %486  ;;  %v249_v12 = vadd.f32 %v242_v61, %v220_v55  ;;  %v562_v6 = vmul.f32 %v560_v21, %v2351_v4 }
  0xfa   :  { %v500_v10 = vadd.f32 %v489_v8, %v471_v2  ;;  %v492_v11 = vsel %vm111_vm0, %v487_v9, %v489_v8  ;;  %v491_v29 = vsel %vm111_vm0, %v485_v56, %v487_v9 }
  0xfb   :  { %v499_v13 = vadd.f32 %v492_v11, %v470_v7  ;;  %v498_v2 = vadd.f32 %v491_v29, %v469_v22 }
  0xfc   :  { %511 = vrot.lane.b32.xlu1 %v500_v10, %s2270_s18 }
  0xfd   :  { %v2534_v14 = vpop.permute.xlu1 %542  ;;  %509 = vrot.lane.b32.xlu0 %v499_v13, %s2270_s18  ;;  %v2537_v15 = vpop.permute.xlu0 %540 }
 0x101   :  { %v2539_v23 = vpop.permute.xlu1 %546  ;;  %v2541_v24 = vpop.permute.xlu0 %544 }
 0x105   :  { %v578_v26 = vpop.permute.xlu1 %577  ;;  %v576_v27 = vpop.permute.xlu0 %575 }
 0x106   :  { %v583_v28 = vsel %vm111_vm0, %v576_v27, %v578_v26 }
 0x107   :  { %v590_v31 = vadd.f32 %v583_v28, %v561_v25 }
 0x109   :  { %v582_v38 = vpop.permute.xlu1 %581  ;;  %598 = vrot.lane.b32.xlu0 %v590_v31, %s2270_s18  ;;  %v580_v40 = vpop.permute.xlu0 %579 }
 0x10a   :  { %v593_v41 = vadd.f32 %v582_v38, %v564_v30  ;;  %v585_v42 = vsel %vm111_vm0, %v580_v40, %v582_v38  ;;  %v584_v7 = vsel %vm111_vm0, %v578_v26, %v580_v40 }
 0x10b   :  { %v592_v47 = vadd.f32 %v585_v42, %v563_v32  ;;  %v591_v35 = vadd.f32 %v584_v7, %v562_v6 }
 0x10c   :  { %604 = vrot.lane.b32.xlu1 %v593_v41, %s2270_s18 }
 0x10d   :  { %602 = vrot.lane.b32.xlu0 %v592_v47, %s2270_s18  ;;  %v2582_v52 = vpop.permute.xlu0 %633  ;;  %v2588_v9 = vpop.permute.xlu1 %635 }
 0x110   :  { %164 = vrot.lane.b32.xlu1 %v155_v49, %s2270_s18  ;;  %v653_v49 = vstv %s2094_s20  ;;  %s2111_s20 = sld [smem:[#allocation8 + $0x2]] }
 0x111   :  { %668 = vrot.lane.b32.xlu0 %v660_v48, %s2269_s4  ;;  %v2584_v56 = vpop.permute.xlu0 %637  ;;  %v2594_v13 = vpop.permute.xlu1 %639  ;;  %v657_v22 = vmul.f32 %v653_v49, %v2349_v3  ;;  %v656_v6 = vmul.f32 %v653_v49, %v2345_v0 }
 0x112   :  { %3789 = vst [vmem:[#allocation18_spill] sm:$0xff] %v2584_v56  ;;  %3793 = vst [vmem:[#allocation22_spill] sm:$0xff] %v2594_v13 }
 0x114   :  { %258 = vrot.lane.b32.xlu1 %v249_v12, %s2270_s18  ;;  %v655_v12 = vmul.f32 %v653_v49, %v2351_v4 }
 0x115   :  { %672 = vrot.lane.b32.xlu0 %v662_v5, %s2269_s4  ;;  %v654_v5 = vmul.f32 %v653_v49, %v2347_v1 }
 0x118   :  { %351 = vrot.lane.b32.xlu1 %v342_v18, %s2270_s18 }
 0x11c   :  { %507 = vrot.lane.b32.xlu1 %v498_v2, %s2270_s18 }
 0x120   :  { %600 = vrot.lane.b32.xlu1 %v591_v35, %s2270_s18 }
 0x124   :  { %670 = vrot.lane.b32.xlu1 %v661_v39, %s2269_s4 }
 0x128   :  { %674 = vrot.lane.b32.xlu1 %v663_v46, %s2269_s4  ;;  %v759_v46 = vstv %s2098_s21  ;;  %s2115_s21 = sld [smem:[#allocation8 + $0x6]] }
 0x129   :  { %v762_v49 = vmul.f32 %v759_v46, %v2345_v0 }
 0x13b   :  { %v2586_v8 = vpop.permute.xlu0 %162 }
 0x13c   :  { %3790 = vst [vmem:[#allocation19_spill] sm:$0xff] %v2586_v8  ;;  %v618_v8 = vstv %s2092_s9  ;;  %s1107_s9 = sld [smem:[#allocation8]] }
 0x13e   :  { %v2598_v25 = vpop.permute.xlu1 %168 }
 0x13f   :  { %v2590_v10 = vpop.permute.xlu0 %166  ;;  %3794 = vst [vmem:[#allocation23_spill] sm:$0xff] %v2598_v25  ;;  %v2772_v25 = vmul.f32 %v618_v8, %v2351_v4 }
 0x140   :  { %3791 = vst [vmem:[#allocation20_spill] sm:$0xff] %v2590_v10 }
 0x14b   :  { %v2592_v11 = vpop.permute.xlu0 %256 }
 0x14c   :  { %3792 = vst [vmem:[#allocation21_spill] sm:$0xff] %v2592_v11  ;;  %v113_v11 = vsel %vm111_vm0, %v2449_v63, %v2441_v59 }
 0x14e   :  { %v2602_v27 = vpop.permute.xlu1 %262 }
 0x14f   :  { %v2596_v21 = vpop.permute.xlu0 %260 }
 0x15b   :  { %v2600_v26 = vpop.permute.xlu0 %349 }
 0x15e   :  { %v2604_v28 = vpop.permute.xlu1 %355 }
 0x15f   :  { %v2606_v30 = vpop.permute.xlu0 %353 }
 0x16b   :  { %v2608_v31 = vpop.permute.xlu0 %505 }
 0x16c   :  { %3795 = vst [vmem:[#allocation24_spill] sm:$0xff] %v2608_v31 }
 0x16e   :  { %v2610_v32 = vpop.permute.xlu1 %511 }
 0x16f   :  { %3796 = vst [vmem:[#allocation25_spill] sm:$0xff] %v2610_v32  ;;  %v2614_v40 = vpop.permute.xlu0 %509 }
 0x170   :  { %3798 = vst [vmem:[#allocation27_spill] sm:$0xff] %v2614_v40 }
 0x17b   :  { %v2618_v42 = vpop.permute.xlu0 %598 }
 0x17c   :  { %3800 = vst [vmem:[#allocation29_spill] sm:$0xff] %v2618_v42  ;;  %v112_v42 = vsel %vm111_vm0, %v2443_v60, %v2449_v63  ;;  %v2784_v60 = vmul.f32 %v618_v8, %v2349_v3 }
 0x17e   :  { %v2612_v38 = vpop.permute.xlu1 %604 }
 0x17f   :  { %3797 = vst [vmem:[#allocation26_spill] sm:$0xff] %v2612_v38  ;;  %v2622_v44 = vpop.permute.xlu0 %602 }
 0x180   :  { %3802 = vst [vmem:[#allocation31_spill] sm:$0xff] %v2622_v44 }
 0x182   :  { %v2616_v41 = vpop.permute.xlu1 %164 }
 0x183   :  { %3799 = vst [vmem:[#allocation28_spill] sm:$0xff] %v2616_v41  ;;  %v669_v48 = vpop.permute.xlu0 %668 }
 0x186   :  { %v2620_v43 = vpop.permute.xlu1 %258 }
 0x187   :  { %3801 = vst [vmem:[#allocation30_spill] sm:$0xff] %v2620_v43  ;;  %v673_v61 = vpop.permute.xlu0 %672  ;;  %v2781_v43 = vmul.f32 %v618_v8, %v2345_v0 }
 0x18a   :  { %v2624_v45 = vpop.permute.xlu1 %351 }
 0x18e   :  { %v2626_v47 = vpop.permute.xlu1 %507 }
 0x18f   :  { %3803 = vst [vmem:[#allocation32_spill] sm:$0xff] %v2626_v47 }
 0x192   :  { %v2628_v55 = vpop.permute.xlu1 %600 }
 0x193   :  { %3804 = vst [vmem:[#allocation33_spill] sm:$0xff] %v2628_v55  ;;  %v619_v55 = vmul.f32 %v618_v8, %v2347_v1 }
 0x196   :  { %v671_v57 = vpop.permute.xlu1 %670 }
 0x197   :  { %v676_v58 = vsel %vm111_vm0, %v669_v48, %v671_v57  ;;  %v677_v18 = vsel %vm111_vm0, %v671_v57, %v673_v61  ;;  %v760_v48 = vmul.f32 %v759_v46, %v2347_v1 }
 0x198   :  { %v683_v29 = vadd.f32 %v676_v58, %v654_v5  ;;  %v684_v2 = vadd.f32 %v677_v18, %v655_v12  ;;  %v761_v5 = vmul.f32 %v759_v46, %v2351_v4  ;;  %v794_v12 = vstv %s2100_s22  ;;  %s2130_s22 = sld [smem:[#allocation8 + $0x15]] }
 0x199   :  { %v796_v57 = vmul.f32 %v794_v12, %v2351_v4  ;;  %v797_v58 = vmul.f32 %v794_v12, %v2345_v0  ;;  %v798_v18 = vmul.f32 %v794_v12, %v2349_v3 }
 0x19a   :  { %v675_v7 = vpop.permute.xlu1 %674  ;;  %691 = vrot.lane.b32.xlu0 %v683_v29, %s2270_s18  ;;  %693 = vrot.lane.b32.xlu1 %v684_v2, %s2270_s18 }
 0x19b   :  { %v678_v35 = vsel %vm111_vm0, %v673_v61, %v675_v7  ;;  %v686_v39 = vadd.f32 %v675_v7, %v657_v22  ;;  %v763_v61 = vmul.f32 %v759_v46, %v2349_v3  ;;  %v887_v22 = vstv %s2104_s23  ;;  %s2139_s23 = sld [smem:[#allocation8 + $0x1d]] }
 0x19c   :  { %v685_v40 = vadd.f32 %v678_v35, %v656_v6  ;;  %v888_v29 = vmul.f32 %v887_v22, %v2347_v1  ;;  %v890_v2 = vmul.f32 %v887_v22, %v2345_v0  ;;  %v980_v6 = vstv %s2108_s24  ;;  %s2143_s24 = sld [smem:[#allocation8 + $0x21]] }
 0x19d   :  { %v981_v7 = vmul.f32 %v980_v6, %v2347_v1  ;;  %v983_v35 = vmul.f32 %v980_v6, %v2345_v0 }
 0x19e   :  { %695 = vrot.lane.b32.xlu0 %v685_v40, %s2270_s18  ;;  %697 = vrot.lane.b32.xlu1 %v686_v39, %s2270_s18  ;;  %v795_v40 = vmul.f32 %v794_v12, %v2347_v1  ;;  %v788_v12 = vstv %s2099_s25  ;;  %s2120_s25 = sld [smem:[#allocation8 + $0xb]] }
 0x19f   :  { %v792_v32 = vmul.f32 %v788_v12, %v2349_v3 }
 0x1a2   :  { %768 = vrot.lane.b32.xlu0 %v760_v48, %s2269_s4  ;;  %770 = vrot.lane.b32.xlu1 %v761_v5, %s2269_s4 }
 0x1a6   :  { %772 = vrot.lane.b32.xlu0 %v762_v49, %s2269_s4  ;;  %774 = vrot.lane.b32.xlu1 %v763_v61, %s2269_s4 }
 0x1aa   :  { %803 = vrot.lane.b32.xlu0 %v795_v40, %s2269_s4  ;;  %805 = vrot.lane.b32.xlu1 %v796_v57, %s2269_s4 }
 0x1ae   :  { %807 = vrot.lane.b32.xlu0 %v797_v58, %s2269_s4  ;;  %809 = vrot.lane.b32.xlu1 %v798_v18, %s2269_s4  ;;  %v789_v58 = vmul.f32 %v788_v12, %v2347_v1 }
 0x1b2   :  { %896 = vrot.lane.b32.xlu1 %v888_v29, %s2269_s4 }
 0x1b6   :  { %900 = vrot.lane.b32.xlu1 %v890_v2, %s2269_s4 }
 0x1ba   :  { %989 = vrot.lane.b32.xlu1 %v981_v7, %s2269_s4 }
 0x1be   :  { %993 = vrot.lane.b32.xlu1 %v983_v35, %s2269_s4  ;;  %v790_v35 = vmul.f32 %v788_v12, %v2351_v4 }
 0x20c   :  { %v2665_v39 = vpop.permute.xlu1 %693  ;;  %v2667_v46 = vpop.permute.xlu0 %691 }
 0x210   :  { %v2669_v48 = vpop.permute.xlu1 %697  ;;  %v2671_v5 = vpop.permute.xlu0 %695 }
 0x211   :  { %3805 = vst [vmem:[#allocation34_spill] sm:$0xff] %v2669_v48  ;;  %3806 = vst [vmem:[#allocation35_spill] sm:$0xff] %v2671_v5 }
 0x214   :  { %v2673_v49 = vpop.permute.xlu1 %770  ;;  %v2675_v61 = vpop.permute.xlu0 %768 }
 0x215   :  { %3807 = vst [vmem:[#allocation36_spill] sm:$0xff] %v2673_v49  ;;  %3808 = vst [vmem:[#allocation37_spill] sm:$0xff] %v2675_v61  ;;  %v889_v61 = vmul.f32 %v887_v22, %v2351_v4 }
 0x218   :  { %v2677_v40 = vpop.permute.xlu1 %774  ;;  %v2679_v57 = vpop.permute.xlu0 %772 }
 0x219   :  { %3809 = vst [vmem:[#allocation38_spill] sm:$0xff] %v2677_v40  ;;  %3810 = vst [vmem:[#allocation39_spill] sm:$0xff] %v2679_v57 }
 0x21c   :  { %v806_v18 = vpop.permute.xlu1 %805  ;;  %v804_v29 = vpop.permute.xlu0 %803 }
 0x21d   :  { %v811_v2 = vsel %vm111_vm0, %v804_v29, %v806_v18 }
 0x21e   :  { %v818_v7 = vadd.f32 %v811_v2, %v789_v58  ;;  %v891_v58 = vmul.f32 %v887_v22, %v2349_v3  ;;  %v852_v2 = vstv %s2102_s26  ;;  %s2122_s26 = sld [smem:[#allocation8 + $0xd]] }
 0x21f   :  { %v854_v48 = vmul.f32 %v852_v2, %v2351_v4 }
 0x220   :  { %826 = vrot.lane.b32.xlu0 %v818_v7, %s2270_s18  ;;  %v808_v49 = vpop.permute.xlu0 %807  ;;  %v810_v57 = vpop.permute.xlu1 %809  ;;  %v982_v7 = vmul.f32 %v980_v6, %v2351_v4 }
 0x221   :  { %v812_v40 = vsel %vm111_vm0, %v806_v18, %v808_v49  ;;  %v821_v29 = vadd.f32 %v810_v57, %v792_v32  ;;  %v856_v32 = vmul.f32 %v852_v2, %v2349_v3  ;;  %v813_v22 = vsel %vm111_vm0, %v808_v49, %v810_v57 }
 0x222   :  { %v819_v5 = vadd.f32 %v812_v40, %v790_v35  ;;  %v984_v40 = vmul.f32 %v980_v6, %v2349_v3  ;;  %v853_v18 = vmul.f32 %v852_v2, %v2347_v1  ;;  %v855_v6 = vmul.f32 %v852_v2, %v2345_v0 }
 0x224   :  { %898 = vrot.lane.b32.xlu0 %v889_v61, %s2269_s4  ;;  %828 = vrot.lane.b32.xlu1 %v819_v5, %s2270_s18  ;;  %v791_v61 = vmul.f32 %v788_v12, %v2345_v0  ;;  %v881_v12 = vstv %s2103_s27  ;;  %s2124_s27 = sld [smem:[#allocation8 + $0xf]] }
 0x225   :  { %v883_v49 = vmul.f32 %v881_v12, %v2351_v4  ;;  %v882_v57 = vmul.f32 %v881_v12, %v2347_v1  ;;  %v885_v2 = vmul.f32 %v881_v12, %v2349_v3 }
 0x226   :  { %v820_v5 = vadd.f32 %v813_v22, %v791_v61  ;;  %v884_v22 = vmul.f32 %v881_v12, %v2345_v0 }
 0x228   :  { %902 = vrot.lane.b32.xlu0 %v891_v58, %s2269_s4  ;;  %832 = vrot.lane.b32.xlu1 %v821_v29, %s2270_s18 }
 0x22c   :  { %991 = vrot.lane.b32.xlu0 %v982_v7, %s2269_s4  ;;  %863 = vrot.lane.b32.xlu1 %v854_v48, %s2269_s4  ;;  %v897_v48 = vpop.permute.xlu1 %896 }
 0x230   :  { %995 = vrot.lane.b32.xlu0 %v984_v40, %s2269_s4  ;;  %867 = vrot.lane.b32.xlu1 %v856_v32, %s2269_s4  ;;  %v901_v29 = vpop.permute.xlu1 %900 }
 0x234   :  { %830 = vrot.lane.b32.xlu0 %v820_v5, %s2270_s18  ;;  %v990_v31 = vpop.permute.xlu1 %989 }
 0x238   :  { %861 = vrot.lane.b32.xlu0 %v853_v18, %s2269_s4 }
 0x23c   :  { %865 = vrot.lane.b32.xlu0 %v855_v6, %s2269_s4 }
 0x292   :  { %v2708_v35 = vpop.permute.xlu0 %826 }
 0x293   :  { %3811 = vst [vmem:[#allocation40_spill] sm:$0xff] %v2708_v35  ;;  %v945_v35 = vstv %s2106_s28  ;;  %s2128_s28 = sld [smem:[#allocation8 + $0x13]] }
 0x294   :  { %v946_v12 = vmul.f32 %v945_v35, %v2347_v1 }
 0x296   :  { %v899_v58 = vpop.permute.xlu0 %898 }
 0x297   :  { %v904_v7 = vsel %vm111_vm0, %v897_v48, %v899_v58  ;;  %v905_v40 = vsel %vm111_vm0, %v899_v58, %v901_v29  ;;  %v994_v58 = vpop.permute.xlu1 %993 }
 0x298   :  { %v912_v61 = vadd.f32 %v905_v40, %v883_v49  ;;  %v911_v32 = vadd.f32 %v904_v7, %v882_v57  ;;  %v947_v49 = vmul.f32 %v945_v35, %v2351_v4  ;;  %v974_v57 = vstv %s2107_s29  ;;  %s2132_s29 = sld [smem:[#allocation8 + $0x17]] }
 0x299   :  { %v976_v7 = vmul.f32 %v974_v57, %v2351_v4 }
 0x29a   :  { %921 = vrot.lane.b32.xlu1 %v912_v61, %s2270_s18  ;;  %919 = vrot.lane.b32.xlu0 %v911_v32, %s2270_s18  ;;  %v903_v5 = vpop.permute.xlu0 %902  ;;  %v975_v32 = vmul.f32 %v974_v57, %v2347_v1 }
 0x29b   :  { %v906_v18 = vsel %vm111_vm0, %v901_v29, %v903_v5  ;;  %v914_v6 = vadd.f32 %v903_v5, %v885_v2  ;;  %v949_v29 = vmul.f32 %v945_v35, %v2349_v3  ;;  %v948_v2 = vmul.f32 %v945_v35, %v2345_v0 }
 0x29c   :  { %v913_v48 = vadd.f32 %v906_v18, %v884_v22  ;;  %v978_v18 = vmul.f32 %v974_v57, %v2349_v3 }
 0x29e   :  { %925 = vrot.lane.b32.xlu1 %v914_v6, %s2270_s18  ;;  %923 = vrot.lane.b32.xlu0 %v913_v48, %s2270_s18  ;;  %v992_v40 = vpop.permute.xlu0 %991  ;;  %v977_v48 = vmul.f32 %v974_v57, %v2345_v0  ;;  %v183_v57 = vstv %s2076_s2  ;;  %s2145_s2 = sld [smem:[#allocation8 + $0x23]] }
 0x29f   :  { %v998_v61 = vsel %vm111_vm0, %v992_v40, %v994_v58  ;;  %v997_v22 = vsel %vm111_vm0, %v990_v31, %v992_v40  ;;  %v88_v31 = vstv %s87_s30  ;;  %s2141_s30 = sld [smem:[#allocation8 + $0x1f]] }
 0x2a0   :  { %v1005_v5 = vadd.f32 %v998_v61, %v976_v7  ;;  %v1004_v6 = vadd.f32 %v997_v22, %v975_v32  ;;  %v276_v7 = vstv %s2080_s7  ;;  %v91_v40 = vmul.f32 %v88_v31, %v2345_v0  ;;  %s2137_s7 = sld [smem:[#allocation8 + $0x1b]] }
 0x2a1   :  { %v187_v32 = vmul.f32 %v183_v57, %v2349_v3  ;;  %v525_v22 = vstv %s2088_s8  ;;  %s2113_s8 = sld [smem:[#allocation8 + $0x4]] }
 0x2a2   :  { %956 = vrot.lane.b32.xlu1 %v947_v49, %s2269_s4  ;;  %954 = vrot.lane.b32.xlu0 %v946_v12, %s2269_s4  ;;  %v996_v49 = vpop.permute.xlu0 %995  ;;  %v526_v13 = vmul.f32 %v525_v22, %v2347_v1  ;;  %v529_v10 = vmul.f32 %v525_v22, %v2349_v3 }
 0x2a3   :  { %v999_v12 = vsel %vm111_vm0, %v994_v58, %v996_v49  ;;  %v1007_v35 = vadd.f32 %v996_v49, %v978_v18  ;;  %v92_v58 = vmul.f32 %v88_v31, %v2349_v3  ;;  %v185_v18 = vmul.f32 %v183_v57, %v2351_v4 }
 0x2a4   :  { %v1006_v47 = vadd.f32 %v999_v12, %v977_v48  ;;  %v277_v48 = vmul.f32 %v276_v7, %v2347_v1  ;;  %v280_v49 = vmul.f32 %v276_v7, %v2349_v3  ;;  %v278_v12 = vmul.f32 %v276_v7, %v2351_v4 }
 0x2a6   :  { %960 = vrot.lane.b32.xlu1 %v949_v29, %s2269_s4  ;;  %958 = vrot.lane.b32.xlu0 %v948_v2, %s2269_s4  ;;  %s2084_s4 = sld [smem:[#allocation2 + $0xc]]  ;;  %v90_v29 = vmul.f32 %v88_v31, %v2351_v4  ;;  %v89_v2 = vmul.f32 %v88_v31, %v2347_v1 }
 0x2a8   :  { %v2794_v63 = vadd.f32 %v112_v42, %v89_v2  ;;  %v2811_v42 = vld [vmem:[%s3767_s5] sm:$0xf]  ;;  %s2856_s5 = sld [smem:[#allocation7 + $0x1]] }
 0x2a9   :  { %3814 = vst [vmem:[#allocation43_spill] sm:$0xff] %v2811_v42 }
 0x2aa   :  { %1014 = vrot.lane.b32.xlu1 %v1005_v5, %s2270_s18  ;;  %1012 = vrot.lane.b32.xlu0 %v1004_v6, %s2270_s18  ;;  %v407_v5 = vlaneseq  ;;  %v186_v6 = vmul.f32 %v183_v57, %v2345_v0 }
 0x2ac   :  { %v432_v61 = vstv %s2084_s4  ;;  %v2764_v56 = vshrl.u32 %v407_v5, 7  ;;  %v206_v5 = vsel %vm111_vm0, %v2470_v17, %v2467_v16  ;;  %v2803_v17 = vadd.f32 %v113_v11, %v90_v29  ;;  %s2126_s4 = sld [smem:[#allocation8 + $0x11]] }
 0x2ad   :  { %v433_v31 = vmul.f32 %v432_v61, %v2347_v1  ;;  %v436_v41 = vmul.f32 %v432_v61, %v2349_v3  ;;  %v434_v44 = vmul.f32 %v432_v61, %v2351_v4  ;;  %v435_v38 = vmul.f32 %v432_v61, %v2345_v0 }
 0x2ae   :  { %1018 = vrot.lane.b32.xlu1 %v1007_v35, %s2270_s18  ;;  %1016 = vrot.lane.b32.xlu0 %v1006_v47, %s2270_s18  ;;  %v184_v47 = vmul.f32 %v183_v57, %v2347_v1  ;;  %v279_v35 = vmul.f32 %v276_v7, %v2345_v0  ;;  %v114_v57 = vsel %vm111_vm0, %v2441_v59, %v2447_v62  ;;  %v2792_v59 = vpop.permute.xlu1 %828  ;;  %s3069_s18 = sld [smem:[#allocation8 + $0x3]] }
 0x2af   :  { %v527_v7 = vmul.f32 %v525_v22, %v2351_v4  ;;  %3812 = vst [vmem:[#allocation41_spill] sm:$0xff] %v2764_v56  ;;  %v528_v61 = vmul.f32 %v525_v22, %v2345_v0  ;;  %v2786_v22 = vadd.f32 %v114_v57, %v91_v40  ;;  %v122_v1 = vadd.f32 %v2447_v62, %v92_v58 }
 0x2b0   :  { %v207_v4 = vsel %vm111_vm0, %v2467_v16, %v2476_v20  ;;  %v208_v0 = vsel %vm111_vm0, %v2476_v20, %v2474_v19  ;;  %v299_v3 = vsel %vm111_vm0, %v2497_v34, %v2494_v33  ;;  %v421_v62 = vsub.s32 3, %v2764_v56  ;;  %3813 = vst [vmem:[#allocation42_spill] sm:$0xff] %v2803_v17 }
 0x2b1   :  { %v213_v8 = vadd.f32 %v206_v5, %v184_v47  ;;  %v300_v16 = vsel %vm111_vm0, %v2494_v33, %v2503_v37  ;;  %v417_v20 = vsub.s32 2, %v2764_v56  ;;  %v216_v58 = vadd.f32 %v2474_v19, %v187_v32  ;;  %v2869_v5 = vpop.permute.xlu0 %830 }
 0x2b2   :  { %v2815_v40 = vadd.f32 %v207_v4, %v185_v18  ;;  %v309_v34 = vadd.f32 %v2501_v36, %v280_v49  ;;  %v301_v11 = vsel %vm111_vm0, %v2503_v37, %v2501_v36  ;;  %v215_v29 = vadd.f32 %v208_v0, %v186_v6 }
 0x2b3   :  { %v306_v2 = vadd.f32 %v299_v3, %v277_v48  ;;  %v455_v33 = vsel %vm111_vm0, %v2521_v51, %v2518_v50  ;;  %v2825_v47 = vstv %s2757_s10  ;;  %v2827_v57 = vadd.f32 %v300_v16, %v278_v12  ;;  %v2845_v48 = vpop.permute.xlu1 %832  ;;  %s2272_s10 = smov 77  }
 0x2b4   :  { %v456_v19 = vsel %vm111_vm0, %v2518_v50, %v2525_v54  ;;  %v2833_v32 = vrot.slane %v2811_v42, %v421_v62  ;;  %v367_v18 = vadd.f32 %v2604_v28, %v309_v34  ;;  %v308_v36 = vadd.f32 %v301_v11, %v279_v35  ;;  %v3817_v34 = vld [vmem:[#allocation23_spill] sm:$0xff] }
 0x2b5   :  { %v457_v37 = vsel %vm111_vm0, %v2525_v54, %v2523_v53  ;;  %v548_v51 = vsel %vm111_vm0, %v2537_v15, %v2534_v14  ;;  %v2843_v6 = vrot.slane %v2811_v42, %v417_v20  ;;  %v2847_v50 = vadd.f32 %v455_v33, %v433_v31  ;;  %v3815_v20 = vld [vmem:[#allocation30_spill] sm:$0xff]  ;;  %v3818_v33 = vld [vmem:[#allocation33_spill] sm:$0xff] }
 0x2b6   :  { %v549_v49 = vsel %vm111_vm0, %v2534_v14, %v2541_v24  ;;  %v274_v12 = vadd.f32 %v2602_v27, %v216_v58  ;;  %v359_v54 = vsel %vm170_vm1, %v2606_v30, %v2604_v28  ;;  %v2859_v15 = vadd.f32 %v2523_v53, %v436_v41  ;;  %v3816_v58 = vld [vmem:[#allocation21_spill] sm:$0xff] }
 0x2b7   :  { %v2861_v35 = vadd.f32 %v456_v19, %v434_v44  ;;  %v550_v31 = vsel %vm111_vm0, %v2541_v24, %v2539_v23  ;;  %v266_v14 = vsel %vm170_vm1, %v2596_v21, %v2602_v27  ;;  %v2871_v4 = vadd.f32 %v457_v37, %v435_v38  ;;  %v2883_v3 = vpop.permute.xlu1 %863  ;;  %v3819_v19 = vld [vmem:[#allocation29_spill] sm:$0xff] }
 0x2b8   :  { %v555_v28 = vadd.f32 %v548_v51, %v526_v13  ;;  %v641_v53 = vsel %vm111_vm0, %v2582_v52, %v2588_v9  ;;  %v389_v41 = vadd.f32 %v2825_v47, %v367_v18  ;;  %v558_v44 = vadd.f32 %v2539_v23, %v529_v10 }
 0x2b9   :  { %v2878_v0 = vadd.f32 %v549_v49, %v527_v7  ;;  %v366_v24 = vadd.f32 %v359_v54, %v308_v36  ;;  %v357_v27 = vsel %vm170_vm1, %v2600_v26, %v2624_v45  ;;  %v557_v38 = vadd.f32 %v550_v31, %v528_v61  ;;  %v2893_v26 = vpop.permute.xlu0 %861  ;;  %v3821_v36 = vld [vmem:[#allocation20_spill] sm:$0xff] }
 0x2ba   :  { %v375_v62 = vrot.slane %v274_v12, 2  ;;  %v273_v13 = vadd.f32 %v266_v14, %v215_v29  ;;  %v699_v52 = vsel %vm170_vm1, %v2667_v46, %v2665_v39  ;;  %v648_v16 = vadd.f32 %v641_v53, %v619_v55  ;;  %v3820_v55 = vld [vmem:[#allocation18_spill] sm:$0xff] }
 0x2bb   :  { %v264_v23 = vsel %vm170_vm1, %v3816_v58, %v3815_v20  ;;  %v409_v10 = vsub.s32 0, %v2764_v56  ;;  %v181_v61 = vadd.f32 %v3817_v34, %v122_v1  ;;  %v397_v11 = vrot.slane %v389_v41, 4 }
 0x2bc   :  { %v364_v29 = vadd.f32 %v357_v27, %v306_v2  ;;  %v606_v46 = vsel %vm170_vm1, %v3819_v19, %v3818_v33  ;;  %v642_v18 = vsel %vm111_vm0, %v2588_v9, %v3820_v55  ;;  %v173_v37 = vsel %vm170_vm1, %v3821_v36, %v3817_v34  ;;  %v3822_v2 = vld [vmem:[#allocation22_spill] sm:$0xff]  ;;  %v2917_v27 = vpop.permute.xlu1 %867  ;;  %v3825_v34 = vld [vmem:[#allocation28_spill] sm:$0xff] }
 0x2bd   :  { %v388_v51 = vadd.f32 %v2825_v47, %v366_v24  ;;  %v706_v49 = vadd.f32 %v699_v52, %v648_v16  ;;  %v383_v12 = vadd.f32 %v375_v62, %v181_v61  ;;  %v374_v54 = vrot.slane %v273_v13, 2  ;;  %v3823_v13 = vld [vmem:[#allocation26_spill] sm:$0xff]  ;;  %v2931_v61 = vpop.permute.xlu0 %865  ;;  %v3827_v19 = vld [vmem:[#allocation32_spill] sm:$0xff] }
 0x2be   :  { %v271_v1 = vadd.f32 %v264_v23, %v213_v8  ;;  %v2907_v31 = vstv %s2856_s5  ;;  %v643_v14 = vsel %vm111_vm0, %v3820_v55, %v3822_v2  ;;  %v651_v53 = vadd.f32 %v3822_v2, %v2784_v60  ;;  %v3824_v8 = vld [vmem:[#allocation31_spill] sm:$0xff]  ;;  %s2121_s5 = sld [smem:[#allocation8 + $0xc]] }
 0x2bf   :  { %v2915_v9 = vrot.slane %v2811_v42, %v409_v10  ;;  %v613_v41 = vadd.f32 %v606_v46, %v555_v28  ;;  %v180_v24 = vadd.f32 %v173_v37, %v2786_v22  ;;  %v405_v62 = vadd.f32 %v397_v11, %v383_v12  ;;  %v3826_v60 = vld [vmem:[#allocation19_spill] sm:$0xff]  ;;  %v3828_v46 = vld [vmem:[#allocation24_spill] sm:$0xff] }
 0x2c0   :  { %v608_v52 = vsel %vm170_vm1, %v3824_v8, %v3823_v13  ;;  %v386_v16 = vadd.f32 %v2825_v47, %v364_v29  ;;  %v649_v58 = vadd.f32 %v642_v18, %v2772_v25  ;;  %v396_v23 = vrot.slane %v388_v51, 4  ;;  %v3829_v29 = vld [vmem:[#allocation34_spill] sm:$0xff] }
 0x2c1   :  { %v171_v10 = vsel %vm170_vm1, %v3826_v60, %v3825_v34  ;;  %v728_v28 = vadd.f32 %v2907_v31, %v706_v49  ;;  %v382_v22 = vadd.f32 %v374_v54, %v180_v24  ;;  %v372_v11 = vrot.slane %v271_v1, 2  ;;  %v3830_v49 = vld [vmem:[#allocation35_spill] sm:$0xff] }
 0x2c2   :  { %v513_v55 = vsel %vm170_vm1, %v3828_v46, %v3827_v19  ;;  %v709_v37 = vadd.f32 %v3829_v29, %v651_v53  ;;  %v616_v25 = vadd.f32 %v3823_v13, %v558_v44  ;;  %v615_v18 = vadd.f32 %v608_v52, %v557_v38  ;;  %v3831_v53 = vld [vmem:[#allocation25_spill] sm:$0xff]  ;;  %v3832_v46 = vld [vmem:[#allocation27_spill] sm:$0xff] }
 0x2c3   :  { %v714_v51 = vrot.slane %v613_v41, 2  ;;  %v701_v12 = vsel %vm170_vm1, %v3830_v49, %v3829_v29  ;;  %v650_v2 = vadd.f32 %v643_v14, %v2781_v43  ;;  %v2945_v54 = vmul.f32 %v2833_v32, %v405_v62 }
 0x2c4   :  { %v178_v1 = vadd.f32 %v171_v10, %v2794_v63  ;;  %v394_v24 = vrot.slane %v386_v16, 4  ;;  %v404_v60 = vadd.f32 %v396_v23, %v382_v22  ;;  %v515_v7 = vsel %vm170_vm1, %v3832_v46, %v3831_v53 }
 0x2c5   :  { %v520_v44 = vadd.f32 %v513_v55, %v2847_v50  ;;  %v736_v38 = vrot.slane %v728_v28, 4  ;;  %v607_v43 = vsel %vm170_vm1, %v3818_v33, %v3824_v8  ;;  %v731_v63 = vadd.f32 %v2907_v31, %v709_v37 }
 0x2c6   :  { %v380_v52 = vadd.f32 %v372_v11, %v178_v1  ;;  %v708_v14 = vadd.f32 %v701_v12, %v650_v2  ;;  %v523_v62 = vadd.f32 %v3831_v53, %v2859_v15  ;;  %v717_v16 = vrot.slane %v616_v25, 2  ;;  %v3833_v1 = vld [vmem:[#allocation36_spill] sm:$0xff] }
 0x2c7   :  { %v716_v50 = vrot.slane %v615_v18, 2  ;;  %v722_v23 = vadd.f32 %v714_v51, %v520_v44  ;;  %v522_v10 = vadd.f32 %v515_v7, %v2871_v4  ;;  %v265_v28 = vsel %vm170_vm1, %v3815_v20, %v2596_v21 }
 0x2c8   :  { %v358_v33 = vsel %vm170_vm1, %v2624_v45, %v2606_v30  ;;  %v402_v8 = vadd.f32 %v394_v24, %v380_v52  ;;  %v2970_v22 = vadd.f32 %v607_v43, %v2878_v0  ;;  %v700_v15 = vsel %vm170_vm1, %v2665_v39, %v3830_v49  ;;  %v2160_v49 = vld [vmem:[#allocation11] sm:$0x3f]  ;;  %v3834_v24 = vld [vmem:[#allocation37_spill] sm:$0xff] }
 0x2c9   :  { %v744_v11 = vadd.f32 %v736_v38, %v722_v23  ;;  %v753_v55 = vstv %s2929_s13  ;;  %v2979_v7 = vmul.f32 %v2843_v6, %v404_v60  ;;  %v739_v21 = vrot.slane %v731_v63, 4  ;;  %v2162_v63 = vld [vmem:[#allocation11 + $0x8] sm:$0x3f]  ;;  %s2127_s13 = sld [smem:[#allocation8 + $0x12]] }
 0x2ca   :  { %v730_v20 = vadd.f32 %v2907_v31, %v708_v14  ;;  %v846_v30 = vstv %s2937_s14  ;;  %v725_v45 = vadd.f32 %v717_v16, %v523_v62  ;;  %v724_v37 = vadd.f32 %v716_v50, %v522_v10  ;;  %v2163_v62 = vld [vmem:[#allocation11 + $0x10] sm:$0x3f]  ;;  %s2140_s14 = sld [smem:[#allocation8 + $0x1e]] }
 0x2cb   :  { %v2984_v0 = vadd.f32 %v265_v28, %v2815_v40  ;;  %v2987_v25 = vadd.f32 %v358_v33, %v2827_v57  ;;  %v2990_v39 = vmul.f32 %v2915_v9, %v402_v8  ;;  %v2995_v18 = vsel %vm170_vm1, %v3827_v19, %v3832_v46  ;;  %v2161_v46 = vld [vmem:[#allocation11 + $0x18] sm:$0x3f] }
 0x2cc   :  { %v707_v51 = vadd.f32 %v700_v15, %v649_v58  ;;  %v754_v12 = vmul.f32 %v2160_v49, %v753_v55  ;;  %v2999_v40 = vmul.f32 %v744_v11, %v2915_v9  ;;  %v776_v57 = vsel %vm111_vm0, %v3834_v24, %v3833_v1  ;;  %v3835_v28 = vld [vmem:[#allocation38_spill] sm:$0xff]  ;;  %v3836_v33 = vld [vmem:[#allocation39_spill] sm:$0xff] }
 0x2cd   :  { %v847_v60 = vmul.f32 %v2160_v49, %v846_v30  ;;  %v747_v38 = vadd.f32 %v739_v21, %v725_v45  ;;  %v738_v52 = vrot.slane %v730_v20, 4  ;;  %v869_v58 = vsel %vm111_vm0, %v2893_v26, %v2883_v3 }
 0x2ce   :  { %v939_v19 = vstv %s2958_s15  ;;  %v757_v43 = vmul.f32 %v2161_v46, %v753_v55  ;;  %v3010_v14 = vmul.f32 %v2162_v63, %v753_v55  ;;  %v756_v16 = vmul.f32 %v2163_v62, %v753_v55  ;;  %s2123_s15 = sld [smem:[#allocation8 + $0xe]] }
 0x2cf   :  { %v850_v50 = vmul.f32 %v2161_v46, %v846_v30  ;;  %v3013_v23 = vadd.f32 %v2907_v31, %v707_v51  ;;  %v783_v10 = vadd.f32 %v776_v57, %v754_v12  ;;  %v778_v8 = vsel %vm111_vm0, %v3836_v33, %v3835_v28 }
 0x2d0   :  { %v876_v15 = vadd.f32 %v869_v58, %v847_v60  ;;  %v849_v21 = vmul.f32 %v2163_v62, %v846_v30  ;;  %v940_v20 = vmul.f32 %v2160_v49, %v939_v19  ;;  %v3022_v55 = vmul.f32 %v747_v38, %v2833_v32  ;;  %v3837_v49 = vld [vmem:[#allocation40_spill] sm:$0xff] }
 0x2d1   :  { %v746_v31 = vadd.f32 %v738_v52, %v724_v37  ;;  %v871_v51 = vsel %vm111_vm0, %v2931_v61, %v2917_v27  ;;  %v786_v57 = vadd.f32 %v3835_v28, %v757_v43  ;;  %v879_v60 = vadd.f32 %v2917_v27, %v850_v50 }
 0x2d2   :  { %v834_v38 = vsel %vm170_vm1, %v3837_v49, %v2792_v59  ;;  %v848_v2 = vmul.f32 %v2162_v63, %v846_v30  ;;  %v943_v52 = vmul.f32 %v2161_v46, %v939_v19  ;;  %v878_v11 = vadd.f32 %v871_v51, %v849_v21 }
 0x2d3   :  { %v942_v56 = vmul.f32 %v2163_v62, %v939_v19  ;;  %v941_v28 = vmul.f32 %v2162_v63, %v939_v19  ;;  %v1048_v50 = vstv %s3008_s16  ;;  %v841_v17 = vadd.f32 %v834_v38, %v783_v10  ;;  %s2125_s16 = sld [smem:[#allocation8 + $0x10]] }
 0x2d4   :  { %v870_v46 = vsel %vm111_vm0, %v2883_v3, %v2931_v61 }
 0x30c   :  { %v2952_v41 = vpop.permute.xlu1 %921  ;;  %v920_v13 = vpop.permute.xlu0 %919 }
 0x30d   :  { %v927_v26 = vsel %vm170_vm1, %v920_v13, %v2952_v41  ;;  %v785_v13 = vadd.f32 %v778_v8, %v756_v16 }
 0x30e   :  { %v934_v58 = vadd.f32 %v927_v26, %v876_v15 }
 0x310   :  { %v926_v29 = vpop.permute.xlu1 %925  ;;  %v2976_v4 = vpop.permute.xlu0 %923  ;;  %v1035_v26 = vrot.slane %v934_v58, 2  ;;  %v877_v58 = vadd.f32 %v870_v46, %v848_v2 }
 0x311   :  { %v929_v37 = vsel %vm170_vm1, %v2976_v4, %v926_v29  ;;  %v937_v42 = vadd.f32 %v926_v29, %v879_v60  ;;  %v836_v29 = vsel %vm170_vm1, %v2869_v5, %v2845_v48  ;;  %v928_v62 = vsel %vm170_vm1, %v2952_v41, %v2976_v4 }
 0x312   :  { %v936_v15 = vadd.f32 %v929_v37, %v878_v11  ;;  %v1043_v60 = vadd.f32 %v1035_v26, %v841_v17  ;;  %v777_v4 = vsel %vm111_vm0, %v3833_v1, %v3836_v33  ;;  %v843_v38 = vadd.f32 %v836_v29, %v785_v13 }
 0x313   :  { %v1038_v63 = vrot.slane %v937_v42, 2  ;;  %v935_v17 = vadd.f32 %v928_v62, %v877_v58  ;;  %v1080_v1 = vrot.slane %v3022_v55, 6  ;;  %v521_v55 = vadd.f32 %v2995_v18, %v2861_v35 }
 0x314   :  { %v957_v53 = vpop.permute.xlu1 %956  ;;  %v955_v44 = vpop.permute.xlu0 %954  ;;  %v1037_v3 = vrot.slane %v936_v15, 2  ;;  %v3067_v15 = vstv %s3048_s17  ;;  %v1203_v58 = vstv %s2114_s1  ;;  %s2131_s17 = sld [smem:[#allocation8 + $0x16]]  ;;  %s2135_s1 = sld [smem:[#allocation8 + $0x19]] }
 0x315   :  { %v962_v12 = vsel %vm111_vm0, %v955_v44, %v957_v53  ;;  %v1101_v35 = vsel %vm1097_vm2, %v2945_v54, %v1080_v1 }
 0x316   :  { %v969_v44 = vadd.f32 %v962_v12, %v940_v20  ;;  %v1045_v2 = vadd.f32 %v1037_v3, %v843_v38 }
 0x318   :  { %v961_v45 = vpop.permute.xlu1 %960  ;;  %v959_v24 = vpop.permute.xlu0 %958 }
 0x319   :  { %v964_v27 = vsel %vm111_vm0, %v959_v24, %v961_v45  ;;  %v963_v30 = vsel %vm111_vm0, %v957_v53, %v959_v24  ;;  %v972_v19 = vadd.f32 %v961_v45, %v943_v52  ;;  %v844_v45 = vadd.f32 %v2845_v48, %v786_v57 }
 0x31a   :  { %v971_v21 = vadd.f32 %v964_v27, %v942_v56  ;;  %v970_v10 = vadd.f32 %v963_v30, %v941_v28  ;;  %v3838_v28 = vrot.slane %v2999_v40, 6  ;;  %v784_v40 = vadd.f32 %v777_v4, %v3010_v14 }
 0x31b   :  { %v387_v14 = vadd.f32 %v2825_v47, %v2987_v25  ;;  %v373_v47 = vrot.slane %v2984_v0, 2  ;;  %v3840_v25 = vld [vmem:[#allocation42_spill] sm:$0xff]  ;;  %v1147_v0 = vstv %s3069_s18  ;;  %s2129_s18 = sld [smem:[#allocation8 + $0x14]] }
 0x31c   :  { %v1015_v43 = vpop.permute.xlu1 %1014  ;;  %v1013_v16 = vpop.permute.xlu0 %1012  ;;  %v1098_v48 = vsel %vm1097_vm2, %v2990_v39, %v3838_v28  ;;  %v1291_v28 = vstv %s2118_s19  ;;  %s2142_s19 = sld [smem:[#allocation8 + $0x20]] }
 0x31d   :  { %v1020_v8 = vsel %vm170_vm1, %v1013_v16, %v1015_v43 }
 0x31e   :  { %v1027_v49 = vadd.f32 %v1020_v8, %v969_v44  ;;  %v750_v44 = vmul.f32 %v746_v31, %v2843_v6  ;;  %v835_v31 = vsel %vm170_vm1, %v2792_v59, %v2869_v5 }
 0x31f   :  { %v842_v5 = vadd.f32 %v835_v31, %v784_v40 }
 0x320   :  { %v1049_v11 = vadd.f32 %v1048_v50, %v1027_v49  ;;  %v1019_v20 = vpop.permute.xlu1 %1018  ;;  %v1017_v53 = vpop.permute.xlu0 %1016  ;;  %v1079_v39 = vrot.slane %v750_v44, 6 }
 0x321   :  { %v1030_v24 = vadd.f32 %v1019_v20, %v972_v19  ;;  %v1021_v51 = vsel %vm170_vm1, %v1015_v43, %v1017_v53  ;;  %v1022_v12 = vsel %vm170_vm1, %v1017_v53, %v1019_v20  ;;  %v1046_v43 = vadd.f32 %v1038_v63, %v844_v45  ;;  %v3841_v20 = vld [vmem:[#allocation41_spill] sm:$0xff] }
 0x322   :  { %v1057_v61 = vrot.slane %v1049_v11, 4  ;;  %v1029_v42 = vadd.f32 %v1022_v12, %v971_v21  ;;  %v1028_v56 = vadd.f32 %v1021_v51, %v970_v10  ;;  %v3842_v53 = vsub.s32 1, %v3841_v20  ;;  %v3843_v10 = vld [vmem:[#allocation43_spill] sm:$0xff] }
 0x323   :  { %v1052_v41 = vadd.f32 %v1048_v50, %v1030_v24  ;;  %v395_v51 = vrot.slane %v387_v14, 4 }
 0x324   :  { %v1065_v37 = vadd.f32 %v1057_v61, %v1043_v60  ;;  %v1051_v52 = vadd.f32 %v1048_v50, %v1029_v42  ;;  %v1050_v13 = vadd.f32 %v1048_v50, %v1028_v56  ;;  %v737_v50 = vrot.slane %v3013_v23, 4 }
 0x325   :  { %v1060_v16 = vrot.slane %v1052_v41, 4  ;;  %v1100_v23 = vsel %vm1097_vm2, %v2979_v7, %v1079_v39  ;;  %v414_v24 = vrot.slane %v3843_v10, %v3842_v53  ;;  %v3152_v39 = vstv %s2130_s22  ;;  %s1385_s22 = sld [smem:[#allocation10]] }
 0x326   :  { %v1069_v57 = vmul.f32 %v1065_v37, %v2915_v9  ;;  %v1059_v27 = vrot.slane %v1051_v52, 4  ;;  %v1036_v9 = vrot.slane %v935_v17, 2  ;;  %v1058_v46 = vrot.slane %v1050_v13, 4 }
 0x327   :  { %v1068_v33 = vadd.f32 %v1060_v16, %v1046_v43  ;;  %v1236_v52 = vstv %s2116_s3  ;;  %v1638_v10 = vstv %s2132_s29  ;;  %s2138_s3 = sld [smem:[#allocation8 + $0x1c]] }
 0x328   :  { %v1089_v8 = vrot.slane %v1069_v57, 4  ;;  %v1067_v26 = vadd.f32 %v1059_v27, %v1045_v2  ;;  %v1044_v62 = vadd.f32 %v1036_v9, %v842_v5  ;;  %v3131_v57 = vstv %s2115_s21  ;;  %s2136_s21 = sld [smem:[#allocation8 + $0x1a]] }
 0x329   :  { %v1072_v30 = vmul.f32 %v1068_v33, %v2833_v32  ;;  %v3839_v32 = vrot.slane %v2970_v22, 2 }
 0x32a   :  { %v3077_v49 = vsel %vm1102_vm3, %v1098_v48, %v1089_v8  ;;  %v1071_v59 = vmul.f32 %v1067_v26, %v2843_v6  ;;  %v172_v6 = vsel %vm170_vm1, %v3825_v34, %v3821_v36  ;;  %v1066_v34 = vadd.f32 %v1058_v46, %v1044_v62 }
 0x32b   :  { %v1092_v29 = vrot.slane %v1072_v30, 4  ;;  %v1114_v19 = vmul.f32 %v3067_v15, %v3077_v49  ;;  %v723_v63 = vadd.f32 %v3839_v32, %v521_v55  ;;  %v179_v11 = vadd.f32 %v172_v6, %v3840_v25 }
 0x32c   :  { %v1091_v18 = vrot.slane %v1071_v59, 4  ;;  %v1070_v61 = vmul.f32 %v1066_v34, %v414_v24  ;;  %v1148_v42 = vmul.f32 %v1147_v0, %v3077_v49  ;;  %v1204_v16 = vmul.f32 %v1203_v58, %v3077_v49 }
 0x32d   :  { %v3094_v21 = vsel %vm1102_vm3, %v1101_v35, %v1092_v29  ;;  %1122 = vrot.lane.b32.xlu0 %v1114_v19, %s2271_s0  ;;  %v745_v54 = vadd.f32 %v737_v50, %v723_v63  ;;  %v381_v12 = vadd.f32 %v373_v47, %v179_v11  ;;  %v3128_v48 = vstv %s2111_s20  ;;  %s3509_s20 = sld [smem:[#allocation8 + $0x22]] }
 0x32e   :  { %v3099_v22 = vsel %vm1102_vm3, %v1100_v23, %v1091_v18  ;;  %v1117_v36 = vmul.f32 %v3067_v15, %v3094_v21  ;;  %v1151_v3 = vmul.f32 %v1147_v0, %v3094_v21  ;;  %v1207_v56 = vmul.f32 %v1203_v58, %v3094_v21 }
 0x32f   :  { %v1116_v7 = vmul.f32 %v3067_v15, %v3099_v22  ;;  %v749_v60 = vmul.f32 %v745_v54, %v414_v24  ;;  %v403_v45 = vadd.f32 %v395_v51, %v381_v12  ;;  %v1090_v4 = vrot.slane %v1070_v61, 4 }
 0x330   :  { %1128 = vrot.lane.b32.xlu1 %v1117_v36, %s2271_s0  ;;  %v1150_v38 = vmul.f32 %v1147_v0, %v3099_v22  ;;  %v1240_v43 = vmul.f32 %v1236_v52, %v3094_v21  ;;  %v1295_v2 = vmul.f32 %v1291_v28, %v3094_v21  ;;  %v1206_v1 = vmul.f32 %v1203_v58, %v3099_v22 }
 0x331   :  { %1126 = vrot.lane.b32.xlu0 %v1116_v7, %s2271_s0  ;;  %v1078_v41 = vrot.slane %v749_v60, 6  ;;  %v428_v37 = vmul.f32 %v414_v24, %v403_v45  ;;  %v1237_v31 = vmul.f32 %v1236_v52, %v3077_v49  ;;  %v1239_v26 = vmul.f32 %v1236_v52, %v3099_v22 }
 0x332   :  { %v1292_v9 = vmul.f32 %v1291_v28, %v3077_v49  ;;  %v3161_v30 = vstv %s2139_s23  ;;  %v3163_v55 = vstv %s2143_s24  ;;  %v1294_v29 = vmul.f32 %v1291_v28, %v3099_v22  ;;  %s2134_s23 = sld [smem:[#allocation8 + $0x18]]  ;;  %s2146_s24 = sld [smem:[#allocation10 + $0x2]] }
 0x333   :  { %v1099_v44 = vsel %vm1097_vm2, %v428_v37, %v1078_v41  ;;  %v3168_v50 = vmul.f32 %v3161_v30, %v3094_v21  ;;  %v3172_v59 = vmul.f32 %v3163_v55, %v3094_v21  ;;  %v1324_v46 = vstv %s2120_s25  ;;  %s2274_s25 = smov [#allocation12]  }
 0x334   :  { %1162 = vrot.lane.b32.xlu1 %v1151_v3, %s2271_s0  ;;  %v3123_v17 = vsel %vm1102_vm3, %v1099_v44, %v1090_v4  ;;  %v1325_v14 = vmul.f32 %v1324_v46, %v3077_v49  ;;  %v1327_v63 = vmul.f32 %v1324_v46, %v3099_v22  ;;  %v1429_v35 = vstv %s2122_s26  ;;  %s2058_s26 = sshll.u32 %s2274_s25, 4  ;;  %s2059_s26 = int_to_ptr.vmem [resolvable:$true] %s2058_s26 }
 0x335   :  { %1156 = vrot.lane.b32.xlu0 %v1148_v42, %s2271_s0  ;;  %v3135_v27 = vmul.f32 %v3128_v48, %v3123_v17  ;;  %v3140_v33 = vmul.f32 %v3131_v57, %v3123_v17  ;;  %v1115_v13 = vmul.f32 %v3067_v15, %v3123_v17  ;;  %v1149_v8 = vmul.f32 %v1147_v0, %v3123_v17  ;;  %p2237_p13 = scmp.lt.s32.totalorder %s2059_s26, %s2059_s26 }
 0x336   :  { %v3157_v15 = vmul.f32 %v3152_v39, %v3094_v21  ;;  %v1205_v40 = vmul.f32 %v1203_v58, %v3123_v17  ;;  %v1238_v5 = vmul.f32 %v1236_v52, %v3123_v17  ;;  %v1293_v19 = vmul.f32 %v1291_v28, %v3123_v17 }
 0x337   :  { %v1326_v32 = vmul.f32 %v1324_v46, %v3123_v17  ;;  %v1328_v18 = vmul.f32 %v1324_v46, %v3094_v21  ;;  %v1430_v6 = vmul.f32 %v1429_v35, %v3077_v49  ;;  %v1431_v23 = vmul.f32 %v1429_v35, %v3123_v17 }
 0x338   :  { %1218 = vrot.lane.b32.xlu1 %v1207_v56, %s2271_s0  ;;  %v1432_v62 = vmul.f32 %v1429_v35, %v3099_v22  ;;  %v1462_v47 = vstv %s2124_s27  ;;  %v1433_v54 = vmul.f32 %v1429_v35, %v3094_v21  ;;  %v1550_v34 = vstv %s2128_s28  ;;  %s2232_s27 = scalar_lea.vmem %s2059_s26, 288 }
 0x339   :  { %1160 = vrot.lane.b32.xlu0 %v1150_v38, %s2271_s0  ;;  %v1463_v36 = vmul.f32 %v1462_v47, %v3077_v49  ;;  %v1551_v7 = vmul.f32 %v1550_v34, %v3077_v49  ;;  %v1552_v25 = vmul.f32 %v1550_v34, %v3123_v17  ;;  %v1553_v11 = vmul.f32 %v1550_v34, %v3099_v22  ;;  %p2233_p12 = scmp.ne.s32.totalorder %s2059_s26, %s2232_s27  ;;  %p2238_p0 = scmp.lt.s32.totalorder %s2232_s27, %s2232_s27 }
 0x33a   :  { %v1554_v53 = vmul.f32 %v1550_v34, %v3094_v21  ;;  %v1639_v24 = vmul.f32 %v1638_v10, %v3077_v49  ;;  %v1640_v51 = vmul.f32 %v1638_v10, %v3123_v17  ;;  %v1641_v0 = vmul.f32 %v1638_v10, %v3099_v22 }
 0x33b   :  { %v1642_v12 = vmul.f32 %v1638_v10, %v3094_v21  ;;  %v1865_v60 = vstv %s2141_s30  ;;  %v1953_v58 = vstv %s2145_s2  ;;  %v1464_v37 = vmul.f32 %v1462_v47, %v3123_v17  ;;  %p2239_p1 = por %p2238_p0, %p2237_p13 }
 0x33c   :  { %1251 = vrot.lane.b32.xlu1 %v1240_v43, %s2271_s0  ;;  %v1866_v3 = vmul.f32 %v1865_v60, %v3077_v49  ;;  %v1867_v61 = vmul.f32 %v1865_v60, %v3123_v17  ;;  %v1868_v42 = vmul.f32 %v1865_v60, %v3099_v22  ;;  %v1869_v45 = vmul.f32 %v1865_v60, %v3094_v21 }
 0x33d   :  { %1212 = vrot.lane.b32.xlu0 %v1204_v16, %s2271_s0  ;;  %v1954_v41 = vmul.f32 %v1953_v58, %v3077_v49  ;;  %v1955_v56 = vmul.f32 %v1953_v58, %v3123_v17  ;;  %v1956_v4 = vmul.f32 %v1953_v58, %v3099_v22  ;;  %v1957_v38 = vmul.f32 %v1953_v58, %v3094_v21  ;;  %p2240_p2 = pnand %p2239_p1, %p2233_p12 }
 0x33e   :  { %v1465_v52 = vmul.f32 %v1462_v47, %v3099_v22  ;;  %v1777_v44 = vstv %s2137_s7  ;;  %v1466_v43 = vmul.f32 %v1462_v47, %v3094_v21  ;;  %v1833_v46 = vmul.f32 %v3161_v30, %v3077_v49 }
 0x33f   :  { %v1778_v16 = vmul.f32 %v1777_v44, %v3077_v49  ;;  %v1779_v28 = vmul.f32 %v1777_v44, %v3123_v17  ;;  %v1921_v35 = vmul.f32 %v3163_v55, %v3077_v49  ;;  %v3289_v10 = vstv %s1107_s9 }
 0x340   :  { %1306 = vrot.lane.b32.xlu1 %v1295_v2, %s2271_s0  ;;  %v1780_v2 = vmul.f32 %v1777_v44, %v3099_v22 }
 0x341   :  { %1216 = vrot.lane.b32.xlu0 %v1206_v1, %s2271_s0  ;;  %v1517_v1 = vstv %s2126_s4 }
 0x342   :  { %v1521_v47 = vmul.f32 %v1517_v1, %v3094_v21 }
 0x344   :  { %1124 = vrot.lane.b32.xlu1 %v1115_v13, %s2271_s0  ;;  %v1781_v13 = vmul.f32 %v1777_v44, %v3094_v21 }
 0x345   :  { %1245 = vrot.lane.b32.xlu0 %v1237_v31, %s2271_s0  ;;  %v1518_v31 = vmul.f32 %v1517_v1, %v3077_v49 }
 0x348   :  { %1158 = vrot.lane.b32.xlu1 %v1149_v8, %s2271_s0  ;;  %v1519_v8 = vmul.f32 %v1517_v1, %v3123_v17 }
 0x349   :  { %1249 = vrot.lane.b32.xlu0 %v1239_v26, %s2271_s0  ;;  %v1520_v26 = vmul.f32 %v1517_v1, %v3099_v22 }
 0x34c   :  { %1214 = vrot.lane.b32.xlu1 %v1205_v40, %s2271_s0  ;;  %v1606_v40 = vmul.f32 %v3152_v39, %v3077_v49 }
 0x34d   :  { %1300 = vrot.lane.b32.xlu0 %v1292_v9, %s2271_s0  ;;  %v1607_v9 = vmul.f32 %v3152_v39, %v3123_v17 }
 0x350   :  { %1247 = vrot.lane.b32.xlu1 %v1238_v5, %s2271_s0  ;;  %v1608_v5 = vmul.f32 %v3152_v39, %v3099_v22 }
 0x351   :  { %1304 = vrot.lane.b32.xlu0 %v1294_v29, %s2271_s0 }
 0x354   :  { %1302 = vrot.lane.b32.xlu1 %v1293_v19, %s2271_s0 }
 0x355   :  { %1333 = vrot.lane.b32.xlu0 %v1325_v14, %s2271_s0  ;;  %v1834_v14 = vmul.f32 %v3161_v30, %v3123_v17 }
 0x358   :  { %1335 = vrot.lane.b32.xlu1 %v1326_v32, %s2271_s0 }
 0x359   :  { %1337 = vrot.lane.b32.xlu0 %v1327_v63, %s2271_s0  ;;  %v1835_v63 = vmul.f32 %v3161_v30, %v3099_v22  ;;  %v1923_v30 = vmul.f32 %v3163_v55, %v3099_v22 }
 0x35c   :  { %1339 = vrot.lane.b32.xlu1 %v1328_v18, %s2271_s0 }
 0x35d   :  { %1438 = vrot.lane.b32.xlu0 %v1430_v6, %s2271_s0  ;;  %v1922_v6 = vmul.f32 %v3163_v55, %v3123_v17 }
 0x360   :  { %1440 = vrot.lane.b32.xlu1 %v1431_v23, %s2271_s0 }
 0x361   :  { %1442 = vrot.lane.b32.xlu0 %v1432_v62, %s2271_s0 }
 0x364   :  { %1444 = vrot.lane.b32.xlu1 %v1433_v54, %s2271_s0  ;;  %v1145_v54 = vmul.f32 %v3128_v48, %v3094_v21 }
 0x365   :  { %1471 = vrot.lane.b32.xlu0 %v1463_v36, %s2271_s0 }
 0x368   :  { %1559 = vrot.lane.b32.xlu1 %v1551_v7, %s2271_s0 }
 0x369   :  { %1561 = vrot.lane.b32.xlu0 %v1552_v25, %s2271_s0  ;;  %v1234_v25 = vmul.f32 %v3131_v57, %v3094_v21 }
 0x36c   :  { %1563 = vrot.lane.b32.xlu1 %v1553_v11, %s2271_s0 }
 0x36d   :  { %1565 = vrot.lane.b32.xlu0 %v1554_v53, %s2271_s0  ;;  %v1198_v53 = vstv %s2113_s8 }
 0x36e   :  { %v1200_v1 = vmul.f32 %v1198_v53, %v3123_v17 }
 0x370   :  { %1647 = vrot.lane.b32.xlu1 %v1639_v24, %s2271_s0  ;;  %v1201_v24 = vmul.f32 %v1198_v53, %v3099_v22 }
 0x371   :  { %1649 = vrot.lane.b32.xlu0 %v1640_v51, %s2271_s0 }
 0x374   :  { %1651 = vrot.lane.b32.xlu1 %v1641_v0, %s2271_s0 }
 0x375   :  { %1653 = vrot.lane.b32.xlu0 %v1642_v12, %s2271_s0 }
 0x378   :  { %1874 = vrot.lane.b32.xlu1 %v1866_v3, %s2271_s0  ;;  %v1109_v3 = vmul.f32 %v3289_v10, %v3077_v49 }
 0x379   :  { %1876 = vrot.lane.b32.xlu0 %v1867_v61, %s2271_s0  ;;  %v1110_v61 = vmul.f32 %v3289_v10, %v3123_v17 }
 0x37c   :  { %1878 = vrot.lane.b32.xlu1 %v1868_v42, %s2271_s0 }
 0x37d   :  { %1880 = vrot.lane.b32.xlu0 %v1869_v45, %s2271_s0 }
 0x380   :  { %1962 = vrot.lane.b32.xlu1 %v1954_v41, %s2271_s0 }
 0x381   :  { %1964 = vrot.lane.b32.xlu0 %v1955_v56, %s2271_s0 }
 0x384   :  { %1966 = vrot.lane.b32.xlu1 %v1956_v4, %s2271_s0 }
 0x385   :  { %1968 = vrot.lane.b32.xlu0 %v1957_v38, %s2271_s0  ;;  %v1142_v38 = vmul.f32 %v3128_v48, %v3077_v49 }
 0x388   :  { %1473 = vrot.lane.b32.xlu1 %v1464_v37, %s2271_s0 }
 0x389   :  { %1475 = vrot.lane.b32.xlu0 %v1465_v52, %s2271_s0 }
 0x38c   :  { %1477 = vrot.lane.b32.xlu1 %v1466_v43, %s2271_s0 }
 0x38d   :  { %1786 = vrot.lane.b32.xlu0 %v1778_v16, %s2271_s0 }
 0x390   :  { %1788 = vrot.lane.b32.xlu1 %v1779_v28, %s2271_s0 }
 0x391   :  { %1790 = vrot.lane.b32.xlu0 %v1780_v2, %s2271_s0  ;;  %v1144_v2 = vmul.f32 %v3128_v48, %v3099_v22  ;;  %v1231_v48 = vmul.f32 %v3131_v57, %v3077_v49 }
 0x394   :  { %1792 = vrot.lane.b32.xlu1 %v1781_v13, %s2271_s0 }
 0x395   :  { %1526 = vrot.lane.b32.xlu0 %v1518_v31, %s2271_s0  ;;  %v1199_v31 = vmul.f32 %v1198_v53, %v3077_v49 }
 0x398   :  { %1528 = vrot.lane.b32.xlu1 %v1519_v8, %s2271_s0 }
 0x399   :  { %1530 = vrot.lane.b32.xlu0 %v1520_v26, %s2271_s0 }
 0x39c   :  { %1614 = vrot.lane.b32.xlu1 %v1606_v40, %s2271_s0 }
 0x39d   :  { %1616 = vrot.lane.b32.xlu0 %v1607_v9, %s2271_s0 }
 0x39f   :  { %v1123_v29 = vpop.permute.xlu0 %1122 }
 0x3a0   :  { %1618 = vrot.lane.b32.xlu1 %v1608_v5, %s2271_s0 }
 0x3a1   :  { %1841 = vrot.lane.b32.xlu0 %v1833_v46, %s2271_s0  ;;  %v1286_v46 = vstv %s2117_s11 }
 0x3a2   :  { %v3263_v19 = vpop.permute.xlu1 %1128 }
 0x3a3   :  { %v3267_v32 = vpop.permute.xlu0 %1126 }
 0x3a4   :  { %1843 = vrot.lane.b32.xlu1 %v1834_v14, %s2271_s0 }
 0x3a5   :  { %1845 = vrot.lane.b32.xlu0 %v1835_v63, %s2271_s0 }
 0x3a6   :  { %v1163_v39 = vpop.permute.xlu1 %1162 }
 0x3a7   :  { %v1157_v18 = vpop.permute.xlu0 %1156  ;;  %v1174_v36 = vadd.f32 %v1163_v39, %v1145_v54  ;;  %v1288_v54 = vmul.f32 %v1286_v46, %v3123_v17 }
 0x3a8   :  { %1929 = vrot.lane.b32.xlu1 %v1921_v35, %s2271_s0 }
 0x3a9   :  { %1931 = vrot.lane.b32.xlu0 %v1922_v6, %s2271_s0 }
 0x3aa   :  { %v1219_v23 = vpop.permute.xlu1 %1218 }
 0x3ab   :  { %v1161_v62 = vpop.permute.xlu0 %1160 }
 0x3ac   :  { %1933 = vrot.lane.b32.xlu1 %v1923_v30, %s2271_s0  ;;  %v1166_v28 = vsel %vm1130_vm4, %v1161_v62, %v1163_v39  ;;  %v1289_v39 = vmul.f32 %v1286_v46, %v3099_v22 }
 0x3ad   :  { %1532 = vrot.lane.b32.xlu0 %v1521_v47, %s2271_s0  ;;  %v1233_v47 = vmul.f32 %v3131_v57, %v3099_v22 }
 0x3ae   :  { %v1252_v34 = vpop.permute.xlu1 %1251 }
 0x3af   :  { %v1213_v7 = vpop.permute.xlu0 %1212  ;;  %v1263_v55 = vadd.f32 %v1252_v34, %v1234_v25 }
 0x3b0   :  { %1185 = vrot.lane.b32.xlu1 %v1174_v36, %s2272_s10 }
 0x3b2   :  { %v1307_v11 = vpop.permute.xlu1 %1306 }
 0x3b3   :  { %v1217_v51 = vpop.permute.xlu0 %1216 }
 0x3b4   :  { %v1222_v0 = vsel %vm1130_vm4, %v1217_v51, %v1219_v23  ;;  %1274 = vrot.lane.b32.xlu1 %v1263_v55, %s2272_s10 }
 0x3b5   :  { %v3294_v12 = vadd.f32 %v1222_v0, %v1201_v24 }
 0x3b6   :  { %v1125_v60 = vpop.permute.xlu1 %1124 }
 0x3b7   :  { %v1131_v42 = vsel %vm1130_vm4, %v1123_v29, %v1125_v60  ;;  %v1132_v45 = vsel %vm1130_vm4, %v1125_v60, %v3267_v32  ;;  %v1246_v58 = vpop.permute.xlu0 %1245 }
 0x3b8   :  { %v3303_v41 = vadd.f32 %v1131_v42, %v1109_v3  ;;  %v3305_v56 = vadd.f32 %v1132_v45, %v1110_v61 }
 0x3ba   :  { %v1159_v4 = vpop.permute.xlu1 %1158 }
 0x3bb   :  { %v1164_v37 = vsel %vm1130_vm4, %v1157_v18, %v1159_v4  ;;  %v1165_v52 = vsel %vm1130_vm4, %v1159_v4, %v1161_v62  ;;  %v1250_v44 = vpop.permute.xlu0 %1249 }
 0x3bc   :  { %v1171_v43 = vadd.f32 %v1164_v37, %v1142_v38  ;;  %v3312_v16 = vadd.f32 %v1165_v52, %v3135_v27  ;;  %v1173_v27 = vadd.f32 %v1166_v28, %v1144_v2  ;;  %v1255_v30 = vsel %vm1130_vm4, %v1250_v44, %v1252_v34 }
 0x3bd   :  { %v1262_v34 = vadd.f32 %v1255_v30, %v1233_v47  ;;  %v1424_v37 = vstv %s2121_s5 }
 0x3be   :  { %v1215_v13 = vpop.permute.xlu1 %1214  ;;  %1179 = vrot.lane.b32.xlu0 %v1171_v43, %s2272_s10  ;;  %v1425_v43 = vmul.f32 %v1424_v37, %v3077_v49  ;;  %v1426_v2 = vmul.f32 %v1424_v37, %v3123_v17 }
 0x3bf   :  { %v1220_v8 = vsel %vm1130_vm4, %v1213_v7, %v1215_v13  ;;  %v1221_v26 = vsel %vm1130_vm4, %v1215_v13, %v1217_v51  ;;  %v1301_v40 = vpop.permute.xlu0 %1300  ;;  %v1287_v7 = vmul.f32 %v1286_v46, %v3077_v49 }
 0x3c0   :  { %v3322_v9 = vadd.f32 %v1220_v8, %v1199_v31  ;;  %v3324_v5 = vadd.f32 %v1221_v26, %v1200_v1  ;;  %v1427_v26 = vmul.f32 %v1424_v37, %v3099_v22 }
 0x3c2   :  { %v1248_v29 = vpop.permute.xlu1 %1247  ;;  %1183 = vrot.lane.b32.xlu0 %v1173_v27, %s2272_s10 }
 0x3c3   :  { %v1253_v14 = vsel %vm1130_vm4, %v1246_v58, %v1248_v29  ;;  %v1254_v63 = vsel %vm1130_vm4, %v1248_v29, %v1250_v44  ;;  %v1305_v35 = vpop.permute.xlu0 %1304 }
 0x3c4   :  { %v1260_v18 = vadd.f32 %v1253_v14, %v1231_v48  ;;  %v3333_v6 = vadd.f32 %v1254_v63, %v3140_v33  ;;  %v1310_v23 = vsel %vm1130_vm4, %v1305_v35, %v1307_v11  ;;  %v3346_v11 = vstv %s2119_s12 }
 0x3c5   :  { %v3337_v62 = vadd.f32 %v1310_v23, %v1289_v39  ;;  %v1319_v51 = vmul.f32 %v3346_v11, %v3077_v49  ;;  %v1322_v61 = vmul.f32 %v3346_v11, %v3094_v21  ;;  %v1321_v42 = vmul.f32 %v3346_v11, %v3099_v22 }
 0x3c6   :  { %v1303_v36 = vpop.permute.xlu1 %1302  ;;  %1268 = vrot.lane.b32.xlu0 %v1260_v18, %s2272_s10  ;;  %v3386_v63 = vstv %s2127_s13 }
 0x3c7   :  { %v1308_v25 = vsel %vm1130_vm4, %v1301_v40, %v1303_v36  ;;  %v1309_v33 = vsel %vm1130_vm4, %v1303_v36, %v1305_v35  ;;  %v1334_v55 = vpop.permute.xlu0 %1333  ;;  %v1548_v35 = vmul.f32 %v3386_v63, %v3094_v21 }
 0x3c8   :  { %v3348_v53 = vadd.f32 %v1308_v25, %v1287_v7  ;;  %v3350_v24 = vadd.f32 %v1309_v33, %v1288_v54  ;;  %v3409_v33 = vstv %s2140_s14 }
 0x3ca   :  { %v3352_v57 = vpop.permute.xlu1 %1335  ;;  %1272 = vrot.lane.b32.xlu0 %v1262_v34, %s2272_s10  ;;  %v1863_v34 = vmul.f32 %v3409_v33, %v3094_v21 }
 0x3cb   :  { %v1341_v0 = vsel %vm1130_vm4, %v1334_v55, %v3352_v57  ;;  %v3359_v60 = vpop.permute.xlu0 %1337 }
 0x3cc   :  { %v1348_v3 = vadd.f32 %v1341_v0, %v1319_v51 }
 0x3ce   :  { %v1340_v45 = vpop.permute.xlu1 %1339  ;;  %1356 = vrot.lane.b32.xlu0 %v1348_v3, %s2272_s10 }
 0x3cf   :  { %v1343_v58 = vsel %vm1130_vm4, %v3359_v60, %v1340_v45  ;;  %v1351_v4 = vadd.f32 %v1340_v45, %v1322_v61  ;;  %v1439_v38 = vpop.permute.xlu0 %1438 }
 0x3d0   :  { %v1350_v52 = vadd.f32 %v1343_v58, %v1321_v42  ;;  %v1456_v58 = vstv %s2123_s15 }
 0x3d1   :  { %1362 = vrot.lane.b32.xlu1 %v1351_v4, %s2272_s10 }
 0x3d2   :  { %v1441_v44 = vpop.permute.xlu1 %1440  ;;  %1360 = vrot.lane.b32.xlu0 %v1350_v52, %s2272_s10 }
 0x3d3   :  { %v1446_v28 = vsel %vm1130_vm4, %v1439_v38, %v1441_v44  ;;  %v1443_v1 = vpop.permute.xlu0 %1442  ;;  %v1457_v38 = vmul.f32 %v1456_v58, %v3077_v49 }
 0x3d4   :  { %v3373_v13 = vadd.f32 %v1446_v28, %v1425_v43  ;;  %v1447_v31 = vsel %vm1130_vm4, %v1441_v44, %v1443_v1  ;;  %v1460_v43 = vmul.f32 %v1456_v58, %v3094_v21  ;;  %v1459_v28 = vmul.f32 %v1456_v58, %v3099_v22 }
 0x3d5   :  { %v3376_v8 = vadd.f32 %v1447_v31, %v1426_v2 }
 0x3d6   :  { %3844 = vst [vmem:[#allocation30_spill] sm:$0xff] %v3373_v13  ;;  %v1445_v40 = vpop.permute.xlu1 %1444 }
 0x3d7   :  { %3845 = vst [vmem:[#allocation21_spill] sm:$0xff] %v3376_v8  ;;  %v1448_v27 = vsel %vm1130_vm4, %v1443_v1, %v1445_v40  ;;  %v1472_v29 = vpop.permute.xlu0 %1471 }
 0x3d8   :  { %v3380_v48 = vadd.f32 %v1448_v27, %v1427_v26 }
 0x3da   :  { %3846 = vst [vmem:[#allocation23_spill] sm:$0xff] %v3380_v48  ;;  %v3382_v46 = vpop.permute.xlu1 %1559 }
 0x3db   :  { %v3384_v14 = vpop.permute.xlu0 %1561 }
 0x3de   :  { %v3388_v39 = vpop.permute.xlu1 %1563 }
 0x3df   :  { %v3392_v18 = vpop.permute.xlu0 %1565  ;;  %v1568_v27 = vsel %vm1130_vm4, %v3384_v14, %v3388_v39 }
 0x3e0   :  { %v3395_v23 = vadd.f32 %v3392_v18, %v1548_v35 }
 0x3e2   :  { %v3397_v30 = vpop.permute.xlu1 %1647 }
 0x3e3   :  { %v3399_v47 = vpop.permute.xlu0 %1649 }
 0x3e6   :  { %v3401_v54 = vpop.permute.xlu1 %1651 }
 0x3e7   :  { %v3403_v36 = vpop.permute.xlu0 %1653 }
 0x3ea   :  { %v3405_v7 = vpop.permute.xlu1 %1874 }
 0x3eb   :  { %v3407_v25 = vpop.permute.xlu0 %1876 }
 0x3ee   :  { %v3411_v55 = vpop.permute.xlu1 %1878 }
 0x3ef   :  { %v3415_v51 = vpop.permute.xlu0 %1880 }
 0x3f0   :  { %v3418_v0 = vadd.f32 %v3415_v51, %v1863_v34 }
 0x3f2   :  { %v3420_v3 = vpop.permute.xlu1 %1962 }
 0x3f3   :  { %v3422_v61 = vpop.permute.xlu0 %1964 }
 0x3f6   :  { %v3424_v42 = vpop.permute.xlu1 %1966 }
 0x3f7   :  { %v3426_v45 = vpop.permute.xlu0 %1968 }
 0x3fa   :  { %v1474_v4 = vpop.permute.xlu1 %1473 }
 0x3fb   :  { %v1479_v37 = vsel %vm1130_vm4, %v1472_v29, %v1474_v4  ;;  %v1476_v52 = vpop.permute.xlu0 %1475  ;;  %v1546_v29 = vmul.f32 %v3386_v63, %v3123_v17 }
 0x3fc   :  { %v1486_v44 = vadd.f32 %v1479_v37, %v1457_v38  ;;  %v1480_v48 = vsel %vm1130_vm4, %v1474_v4, %v1476_v52 }
 0x3fd   :  { %v1575_v38 = vadd.f32 %v1568_v27, %v1546_v29 }
 0x3fe   :  { %v1478_v2 = vpop.permute.xlu1 %1477  ;;  %1494 = vrot.lane.b32.xlu0 %v1486_v44, %s2272_s10 }
 0x3ff   :  { %v1481_v1 = vsel %vm1130_vm4, %v1476_v52, %v1478_v2  ;;  %v1489_v31 = vadd.f32 %v1478_v2, %v1460_v43  ;;  %v3434_v26 = vpop.permute.xlu0 %1786  ;;  %v3452_v43 = vstv %s2125_s16  ;;  %v1320_v2 = vmul.f32 %v3346_v11, %v3123_v17 }
 0x400   :  { %v1488_v40 = vadd.f32 %v1481_v1, %v1459_v28  ;;  %v1342_v28 = vsel %vm1130_vm4, %v3352_v57, %v3359_v60  ;;  %v3459_v1 = vstv %s2131_s17  ;;  %v1513_v27 = vmul.f32 %v3452_v43, %v3077_v49 }
 0x401   :  { %1500 = vrot.lane.b32.xlu1 %v1489_v31, %s2272_s10  ;;  %v1634_v31 = vmul.f32 %v3459_v1, %v3123_v17  ;;  %v1349_v11 = vadd.f32 %v1342_v28, %v1320_v2  ;;  %v1514_v60 = vmul.f32 %v3452_v43, %v3123_v17 }
 0x402   :  { %v3442_v35 = vpop.permute.xlu1 %1788  ;;  %1498 = vrot.lane.b32.xlu0 %v1488_v40, %s2272_s10 }
 0x403   :  { %v3445_v34 = vpop.permute.xlu0 %1790 }
 0x405   :  { %1181 = vrot.lane.b32.xlu1 %v3312_v16, %s2272_s10  ;;  %v1656_v16 = vsel %vm1130_vm4, %v3399_v47, %v3401_v54 }
 0x406   :  { %v3449_v37 = vpop.permute.xlu1 %1792  ;;  %1584 = vrot.lane.b32.xlu0 %v1575_v38, %s2272_s10  ;;  %v3477_v38 = vstv %s2129_s18 }
 0x407   :  { %v1527_v44 = vpop.permute.xlu0 %1526  ;;  %v1601_v4 = vmul.f32 %v3477_v38, %v3077_v49 }
 0x409   :  { %1270 = vrot.lane.b32.xlu1 %v3333_v6, %s2272_s10  ;;  %v1663_v6 = vadd.f32 %v1656_v16, %v1634_v31  ;;  %v1567_v16 = vsel %vm1130_vm4, %v3382_v46, %v3384_v14  ;;  %v1545_v31 = vmul.f32 %v3386_v63, %v3077_v49 }
 0x40a   :  { %v1529_v40 = vpop.permute.xlu1 %1528  ;;  %1620 = vrot.lane.b32.xlu0 %v3157_v15, %s2271_s0  ;;  %v1458_v15 = vmul.f32 %v1456_v58, %v3123_v17 }
 0x40b   :  { %v1534_v57 = vsel %vm1130_vm4, %v1527_v44, %v1529_v40  ;;  %v3475_v29 = vpop.permute.xlu0 %1530  ;;  %v3488_v44 = vstv %s2135_s1  ;;  %v1574_v46 = vadd.f32 %v1567_v16, %v1545_v31 }
 0x40c   :  { %v3480_v8 = vadd.f32 %v1534_v57, %v1513_v27  ;;  %v1535_v13 = vsel %vm1130_vm4, %v1529_v40, %v3475_v29  ;;  %v1487_v20 = vadd.f32 %v1480_v48, %v1458_v15  ;;  %v1745_v58 = vmul.f32 %v3488_v44, %v3077_v49 }
 0x40d   :  { %v3485_v28 = vadd.f32 %v1535_v13, %v1514_v60  ;;  %1358 = vrot.lane.b32.xlu1 %v1349_v11, %s2272_s10  ;;  %v1602_v48 = vmul.f32 %v3477_v38, %v3123_v17  ;;  %v3513_v57 = vstv %s2138_s3  ;;  %v1547_v15 = vmul.f32 %v3386_v63, %v3099_v22 }
 0x40e   :  { %v1615_v2 = vpop.permute.xlu1 %1614  ;;  %1672 = vrot.lane.b32.xlu0 %v1663_v6, %s2272_s10  ;;  %v1747_v6 = vmul.f32 %v3488_v44, %v3099_v22  ;;  %v1829_v63 = vmul.f32 %v3513_v57, %v3123_v17 }
 0x40f   :  { %v1617_v52 = vpop.permute.xlu0 %1616 }
 0x410   :  { %v1622_v13 = vsel %vm1130_vm4, %v1615_v2, %v1617_v52  ;;  %v1882_v2 = vsel %vm1130_vm4, %v3405_v7, %v3407_v25  ;;  %v3538_v7 = vstv %s2142_s19 }
 0x411   :  { %v3501_v40 = vadd.f32 %v1622_v13, %v1601_v4  ;;  %1496 = vrot.lane.b32.xlu1 %v1487_v20, %s2272_s10  ;;  %v1569_v20 = vsel %vm1130_vm4, %v3388_v39, %v3392_v18  ;;  %v1860_v4 = vmul.f32 %v3409_v33, %v3077_v49  ;;  %v1828_v39 = vmul.f32 %v3513_v57, %v3077_v49 }
 0x412   :  { %v3506_v27 = vpop.permute.xlu1 %1618  ;;  %1753 = vrot.lane.b32.xlu0 %v1745_v58, %s2271_s0  ;;  %v1655_v58 = vsel %vm1130_vm4, %v3397_v30, %v3399_v47  ;;  %v1862_v30 = vmul.f32 %v3409_v33, %v3099_v22 }
 0x413   :  { %v1623_v14 = vsel %vm1130_vm4, %v1617_v52, %v3506_v27  ;;  %v1842_v11 = vpop.permute.xlu0 %1841  ;;  %v1576_v52 = vadd.f32 %v1569_v20, %v1547_v15  ;;  %v1889_v31 = vadd.f32 %v1882_v2, %v1860_v4  ;;  %v1947_v15 = vstv %s3509_s20 }
 0x414   :  { %v3518_v60 = vadd.f32 %v1623_v14, %v1602_v48  ;;  %v1633_v14 = vmul.f32 %v3459_v1, %v3077_v49  ;;  %v1916_v2 = vmul.f32 %v3538_v7, %v3077_v49 }
 0x415   :  { %1582 = vrot.lane.b32.xlu1 %v1574_v46, %s2272_s10 }
 0x416   :  { %v1844_v18 = vpop.permute.xlu1 %1843  ;;  %1757 = vrot.lane.b32.xlu0 %v1747_v6, %s2271_s0  ;;  %v1662_v6 = vadd.f32 %v1655_v58, %v1633_v14  ;;  %v1948_v58 = vmul.f32 %v1947_v15, %v3077_v49 }
 0x417   :  { %v1849_v16 = vsel %vm1130_vm4, %v1842_v11, %v1844_v18  ;;  %v3536_v13 = vpop.permute.xlu0 %1845  ;;  %v1884_v11 = vsel %vm1130_vm4, %v3411_v55, %v3415_v51  ;;  %v1657_v51 = vsel %vm1130_vm4, %v3401_v54, %v3403_v36 }
 0x418   :  { %v3543_v48 = vadd.f32 %v1849_v16, %v1828_v39  ;;  %v1850_v46 = vsel %vm1130_vm4, %v1844_v18, %v3536_v13  ;;  %v1891_v39 = vadd.f32 %v1884_v11, %v1862_v30  ;;  %v1970_v16 = vsel %vm1130_vm4, %v3420_v3, %v3422_v61 }
 0x419   :  { %v3552_v20 = vadd.f32 %v1850_v46, %v1829_v63  ;;  %1586 = vrot.lane.b32.xlu1 %v1576_v52, %s2272_s10  ;;  %v1635_v52 = vmul.f32 %v3459_v1, %v3099_v22  ;;  %v1515_v3 = vmul.f32 %v3452_v43, %v3099_v22  ;;  %v1977_v30 = vadd.f32 %v1970_v16, %v1948_v58 }
 0x41a   :  { %v1930_v47 = vpop.permute.xlu1 %1929  ;;  %1897 = vrot.lane.b32.xlu0 %v1889_v31, %s2272_s10  ;;  %v1917_v31 = vmul.f32 %v3538_v7, %v3123_v17  ;;  %v1746_v43 = vmul.f32 %v3488_v44, %v3123_v17  ;;  %v1883_v16 = vsel %vm1130_vm4, %v3407_v25, %v3411_v55  ;;  %v1861_v58 = vmul.f32 %v3409_v33, %v3123_v17 }
 0x41b   :  { %v1932_v4 = vpop.permute.xlu0 %1931  ;;  %v1664_v46 = vadd.f32 %v1657_v51, %v1635_v52  ;;  %v1796_v25 = vsel %vm1130_vm4, %v3445_v34, %v3449_v37 }
 0x41c   :  { %v1937_v18 = vsel %vm1130_vm4, %v1930_v47, %v1932_v4 }
 0x41d   :  { %v3570_v63 = vadd.f32 %v1937_v18, %v1916_v2  ;;  %1670 = vrot.lane.b32.xlu1 %v1662_v6, %s2272_s10  ;;  %v1972_v2 = vsel %vm1130_vm4, %v3424_v42, %v3426_v45  ;;  %v1771_v18 = vstv %s2136_s21 }
 0x41e   :  { %v3576_v54 = vpop.permute.xlu1 %1933  ;;  %1901 = vrot.lane.b32.xlu0 %v1891_v39, %s2272_s10  ;;  %v1774_v33 = vmul.f32 %v1771_v18, %v3099_v22 }
 0x41f   :  { %v1938_v14 = vsel %vm1130_vm4, %v1932_v4, %v3576_v54  ;;  %v1533_v11 = vpop.permute.xlu0 %1532  ;;  %v1950_v4 = vmul.f32 %v1947_v15, %v3099_v22 }
 0x420   :  { %v3583_v47 = vadd.f32 %v1938_v14, %v1917_v31  ;;  %v1536_v6 = vsel %vm1130_vm4, %v3475_v29, %v1533_v11  ;;  %v1636_v29 = vmul.f32 %v3459_v1, %v3094_v21  ;;  %v1794_v31 = vsel %vm1130_vm4, %v3434_v26, %v3442_v35 }
 0x421   :  { %v3590_v39 = vadd.f32 %v1536_v6, %v1515_v3  ;;  %1674 = vrot.lane.b32.xlu1 %v1664_v46, %s2272_s10  ;;  %v1979_v51 = vadd.f32 %v1972_v2, %v1950_v4  ;;  %v1772_v1 = vmul.f32 %v1771_v18, %v3077_v49  ;;  %v1890_v46 = vadd.f32 %v1883_v16, %v1861_v58 }
 0x422   :  { %1985 = vrot.lane.b32.xlu0 %v1977_v30, %s2272_s10  ;;  %v1665_v52 = vadd.f32 %v3403_v36, %v1636_v29  ;;  %v1803_v55 = vadd.f32 %v1796_v25, %v1774_v33  ;;  %v1949_v14 = vmul.f32 %v1947_v15, %v3123_v17  ;;  %v1951_v3 = vmul.f32 %v1947_v15, %v3094_v21  ;;  %v1186_v2 = vpop.permute.xlu1 %1185 }
 0x423   :  { %v1801_v36 = vadd.f32 %v1794_v31, %v1772_v1  ;;  %v1795_v15 = vsel %vm1130_vm4, %v3442_v35, %v3445_v34  ;;  %v1775_v31 = vmul.f32 %v1771_v18, %v3094_v21  ;;  %v1386_v1 = vstv %s1385_s22 }
 0x424   :  { %v1980_v30 = vadd.f32 %v3426_v45, %v1951_v3  ;;  %v1111_v45 = vmul.f32 %v3289_v10, %v3099_v22 }
 0x425   :  { %1755 = vrot.lane.b32.xlu1 %v1746_v43, %s2271_s0 }
 0x426   :  { %1989 = vrot.lane.b32.xlu0 %v1979_v51, %s2272_s10  ;;  %v1275_v4 = vpop.permute.xlu1 %1274  ;;  %v1773_v51 = vmul.f32 %v1771_v18, %v3123_v17 }
 0x429   :  { %1847 = vrot.lane.b32.xlu1 %v3168_v50, %s2271_s0  ;;  %v1971_v50 = vsel %vm1130_vm4, %v3422_v61, %v3424_v42  ;;  %v1748_v42 = vmul.f32 %v3488_v44, %v3094_v21  ;;  %v1802_v44 = vadd.f32 %v1795_v15, %v1773_v51 }
 0x42a   :  { %1676 = vrot.lane.b32.xlu0 %v1665_v52, %s2272_s10  ;;  %v1978_v11 = vadd.f32 %v1971_v50, %v1949_v14 }
 0x42d   :  { %1899 = vrot.lane.b32.xlu1 %v1890_v46, %s2272_s10 }
 0x42e   :  { %1809 = vrot.lane.b32.xlu0 %v1801_v36, %s2272_s10 }
 0x430   :  { %v1180_v26 = vpop.permute.xlu0 %1179 }
 0x431   :  { %1935 = vrot.lane.b32.xlu1 %v3172_v59, %s2271_s0  ;;  %v1133_v59 = vsel %vm1130_vm4, %v3267_v32, %v3263_v19 }
 0x432   :  { %1813 = vrot.lane.b32.xlu0 %v1803_v55, %s2272_s10  ;;  %v1139_v19 = vadd.f32 %v1133_v59, %v1111_v45  ;;  %v2273_v45 = vmov 1983009808  }
 0x433   :  { %v1407_v15 = vunpack.c.l.s4 %v2273_v45 }
 0x434   :  { %v1184_v6 = vpop.permute.xlu0 %1183 }
 0x435   :  { %1987 = vrot.lane.b32.xlu1 %v1978_v11, %s2272_s10 }
 0x436   :  { %1991 = vrot.lane.b32.xlu0 %v1980_v30, %s2272_s10 }
 0x438   :  { %v1269_v61 = vpop.permute.xlu0 %1268 }
 0x439   :  { %1588 = vrot.lane.b32.xlu1 %v3395_v23, %s2272_s10  ;;  %v1190_v23 = vsel %vm1187_vm5, %v1184_v6, %v1186_v2 }
 0x43a   :  { %v1196_v10 = vadd.f32 %v1190_v23, %v1139_v19 }
 0x43c   :  { %v1273_v43 = vpop.permute.xlu0 %1272 }
 0x43d   :  { %v1278_v29 = vsel %vm1187_vm5, %v1273_v43, %v1275_v4  ;;  %1759 = vrot.lane.b32.xlu1 %v1748_v42, %s2271_s0  ;;  %s2133_s0 = sld [smem:[#allocation10 + $0x1]] }
 0x43e   :  { %v1284_v32 = vadd.f32 %v1278_v29, %v3294_v12  ;;  %v1804_v12 = vadd.f32 %v3449_v37, %v1775_v31  ;;  %v3847_v31 = vld [vmem:[#allocation41_spill] sm:$0xff] }
 0x440   :  { %v1378_v52 = vrot.slane %v1284_v32, 2  ;;  %v1357_v16 = vpop.permute.xlu0 %1356 }
 0x441   :  { %1811 = vrot.lane.b32.xlu1 %v1802_v44, %s2272_s10  ;;  %v1408_v44 = vunpack.c.0.s8 %v1407_v15 }
 0x442   :  { %v1384_v35 = vadd.f32 %v1378_v52, %v1196_v10 }
 0x443   :  { %v1363_v34 = vpop.permute.xlu1 %1362 }
 0x444   :  { %v1361_v58 = vpop.permute.xlu0 %1360 }
 0x445   :  { %v1366_v46 = vsel %vm1187_vm5, %v1361_v58, %v1363_v34  ;;  %1903 = vrot.lane.b32.xlu1 %v3418_v0, %s2272_s10 }
 0x446   :  { %v1372_v36 = vadd.f32 %v1366_v46, %v3337_v62  ;;  %v3677_v46 = vsub.s32 %v1408_v44, %v3847_v31 }
 0x448   :  { %v1389_v25 = vadd.f32 %v1386_v1, %v1372_v36 }
 0x449   :  { %1815 = vrot.lane.b32.xlu1 %v1804_v12, %s2272_s10 }
 0x44a   :  { %v1395_v33 = vrot.slane %v1389_v25, 4 }
 0x44c   :  { %v1401_v50 = vadd.f32 %v1395_v33, %v1384_v35 }
 0x44e   :  { %v1419_v33 = vrot.slane %v1401_v50, %v3677_v46 }
 0x470   :  { %v1495_v55 = vpop.permute.xlu0 %1494 }
 0x473   :  { %v3656_v14 = vpop.permute.xlu1 %1500 }
 0x474   :  { %v3658_v3 = vpop.permute.xlu0 %1498 }
 0x477   :  { %v1182_v21 = vpop.permute.xlu1 %1181 }
 0x478   :  { %v1585_v18 = vpop.permute.xlu0 %1584  ;;  %v1188_v30 = vsel %vm1187_vm5, %v1180_v26, %v1182_v21  ;;  %v1189_v0 = vsel %vm1187_vm5, %v1182_v21, %v1184_v6  ;;  %v3848_v21 = vld [vmem:[#allocation30_spill] sm:$0xff] }
 0x479   :  { %v1194_v4 = vadd.f32 %v1188_v30, %v3303_v41  ;;  %v1195_v51 = vadd.f32 %v1189_v0, %v3305_v56 }
 0x47b   :  { %v1271_v11 = vpop.permute.xlu1 %1270 }
 0x47c   :  { %v1276_v62 = vsel %vm1187_vm5, %v1269_v61, %v1271_v11  ;;  %v1277_v37 = vsel %vm1187_vm5, %v1271_v11, %v1273_v43  ;;  %v3664_v2 = vpop.permute.xlu0 %1620 }
 0x47d   :  { %v1282_v59 = vadd.f32 %v1276_v62, %v3322_v9  ;;  %v1283_v42 = vadd.f32 %v1277_v37, %v3324_v5 }
 0x47f   :  { %v1376_v23 = vrot.slane %v1282_v59, 2  ;;  %v1377_v26 = vrot.slane %v1283_v42, 2  ;;  %v1359_v29 = vpop.permute.xlu1 %1358 }
 0x480   :  { %v1364_v6 = vsel %vm1187_vm5, %v1357_v16, %v1359_v29  ;;  %v1365_v61 = vsel %vm1187_vm5, %v1359_v29, %v1361_v58  ;;  %v1673_v43 = vpop.permute.xlu0 %1672 }
 0x481   :  { %v1382_v19 = vadd.f32 %v1376_v23, %v1194_v4  ;;  %v1383_v32 = vadd.f32 %v1377_v26, %v1195_v51  ;;  %v1370_v9 = vadd.f32 %v1364_v6, %v3348_v53  ;;  %v1371_v5 = vadd.f32 %v1365_v61, %v3350_v24  ;;  %v3849_v4 = vld [vmem:[#allocation21_spill] sm:$0xff] }
 0x482   :  { %v1700_v23 = vstv %s2133_s0 }
 0x483   :  { %v1387_v10 = vadd.f32 %v1386_v1, %v1370_v9  ;;  %v1388_v52 = vadd.f32 %v1386_v1, %v1371_v5  ;;  %v1497_v41 = vpop.permute.xlu1 %1496 }
 0x484   :  { %v3674_v35 = vpop.permute.xlu0 %1753  ;;  %v1502_v12 = vsel %vm1187_vm5, %v1495_v55, %v1497_v41  ;;  %v1503_v37 = vsel %vm1187_vm5, %v1497_v41, %v3658_v3 }
 0x485   :  { %v1393_v56 = vrot.slane %v1387_v10, 4  ;;  %v1394_v34 = vrot.slane %v1388_v52, 4  ;;  %v1508_v11 = vadd.f32 %v1502_v12, %v3848_v21  ;;  %v1739_v21 = vstv %s2134_s23 }
 0x487   :  { %v1399_v16 = vadd.f32 %v1393_v56, %v1382_v19  ;;  %v1400_v58 = vadd.f32 %v1394_v34, %v1383_v32  ;;  %v1583_v36 = vpop.permute.xlu1 %1582 }
 0x488   :  { %v1590_v53 = vsel %vm1187_vm5, %v1583_v36, %v1585_v18  ;;  %v3681_v25 = vpop.permute.xlu0 %1757 }
 0x489   :  { %v1405_v24 = vcombine.low %v1399_v16, %v1400_v58  ;;  %v1596_v1 = vadd.f32 %v1590_v53, %v3480_v8  ;;  %v1509_v8 = vadd.f32 %v1503_v37, %v3849_v4  ;;  %v1740_v37 = vmul.f32 %v1739_v21, %v3077_v49 }
 0x48b   :  { %v1690_v30 = vrot.slane %v1596_v1, 2  ;;  %v1587_v0 = vpop.permute.xlu1 %1586  ;;  %v1412_v62 = vrot.slane %v1405_v24, %v3677_v46 }
 0x48c   :  { %v1591_v55 = vsel %vm1187_vm5, %v1585_v18, %v1587_v0  ;;  %v1898_v59 = vpop.permute.xlu0 %1897 }
 0x48d   :  { %v1696_v42 = vadd.f32 %v1690_v30, %v1508_v11  ;;  %v1597_v45 = vadd.f32 %v1591_v55, %v3485_v28  ;;  %v1420_v15 = vcombine.low %v1412_v62, %v1419_v33  ;;  %v1504_v30 = vsel %vm1187_vm5, %v3658_v3, %v3656_v14 }
 0x48e   :  { %v2015_v14 = vstv %s2146_s24 }
 0x48f   :  { %v1691_v51 = vrot.slane %v1597_v45, 2  ;;  %v1671_v50 = vpop.permute.xlu1 %1670  ;;  %1422 = vst [vmem:[#allocation12] sm:$0x3f] %v1420_v15  ;;  %v3850_v15 = vld [vmem:[#allocation23_spill] sm:$0xff] }
 0x490   :  { %v1678_v26 = vsel %vm1187_vm5, %v1671_v50, %v1673_v43  ;;  %v3693_v29 = vpop.permute.xlu0 %1901  ;;  %v1510_v4 = vadd.f32 %v1504_v30, %v3850_v15 }
 0x491   :  { %v1697_v6 = vadd.f32 %v1691_v51, %v1509_v8  ;;  %v1684_v61 = vadd.f32 %v1678_v26, %v3501_v40 }
 0x493   :  { %v1701_v19 = vadd.f32 %v1700_v23, %v1684_v61  ;;  %v1675_v18 = vpop.permute.xlu1 %1674 }
 0x494   :  { %v1679_v32 = vsel %vm1187_vm5, %v1673_v43, %v1675_v18  ;;  %v1986_v9 = vpop.permute.xlu0 %1985  ;;  %v1624_v43 = vsel %vm1130_vm4, %v3506_v27, %v3664_v2 }
 0x495   :  { %v1707_v28 = vrot.slane %v1701_v19, 4  ;;  %v1685_v5 = vadd.f32 %v1679_v32, %v3518_v60  ;;  %v1603_v60 = vmul.f32 %v3477_v38, %v3099_v22 }
 0x497   :  { %v1713_v44 = vadd.f32 %v1707_v28, %v1696_v42  ;;  %v1702_v10 = vadd.f32 %v1700_v23, %v1685_v5  ;;  %v1756_v52 = vpop.permute.xlu1 %1755  ;;  %v1630_v24 = vadd.f32 %v1624_v43, %v1603_v60 }
 0x498   :  { %v1990_v41 = vpop.permute.xlu0 %1989  ;;  %v1761_v51 = vsel %vm1130_vm4, %v3674_v35, %v1756_v52 }
 0x499   :  { %v1708_v56 = vrot.slane %v1702_v10, 4 }
 0x49b   :  { %v1714_v34 = vadd.f32 %v1708_v56, %v1697_v6  ;;  %v1848_v31 = vpop.permute.xlu1 %1847 }
 0x49c   :  { %v1677_v58 = vpop.permute.xlu0 %1676 }
 0x49d   :  { %v1719_v16 = vcombine.low %v1713_v44, %v1714_v34  ;;  %v1680_v53 = vsel %vm1187_vm5, %v1675_v18, %v1677_v58  ;;  %v1767_v18 = vadd.f32 %v1761_v51, %v1740_v37 }
 0x49e   :  { %v1686_v33 = vadd.f32 %v1680_v53, %v1630_v24  ;;  %v1742_v24 = vmul.f32 %v1739_v21, %v3099_v22 }
 0x49f   :  { %v1900_v36 = vpop.permute.xlu1 %1899 }
 0x4a0   :  { %v1810_v12 = vpop.permute.xlu0 %1809  ;;  %v1703_v55 = vadd.f32 %v1700_v23, %v1686_v33  ;;  %v1905_v42 = vsel %vm1187_vm5, %v1898_v59, %v1900_v36  ;;  %v1906_v8 = vsel %vm1187_vm5, %v1900_v36, %v3693_v29  ;;  %v1830_v23 = vmul.f32 %v3513_v57, %v3099_v22 }
 0x4a1   :  { %v1911_v26 = vadd.f32 %v1905_v42, %v3543_v48  ;;  %v1912_v35 = vadd.f32 %v1906_v8, %v3552_v20 }
 0x4a2   :  { %v1709_v61 = vrot.slane %v1703_v55, 4 }
 0x4a3   :  { %v1936_v40 = vpop.permute.xlu1 %1935  ;;  %v2005_v44 = vrot.slane %v1911_v26, 2 }
 0x4a4   :  { %v3704_v11 = vpop.permute.xlu0 %1813  ;;  %v1939_v19 = vsel %vm1130_vm4, %v3576_v54, %v1936_v40 }
 0x4a7   :  { %v1988_v1 = vpop.permute.xlu1 %1987 }
 0x4a8   :  { %v1993_v62 = vsel %vm1187_vm5, %v1986_v9, %v1988_v1  ;;  %v1994_v2 = vsel %vm1187_vm5, %v1988_v1, %v1990_v41  ;;  %v1992_v6 = vpop.permute.xlu0 %1991 }
 0x4a9   :  { %v1999_v3 = vadd.f32 %v1993_v62, %v3570_v63  ;;  %v2000_v49 = vadd.f32 %v1994_v2, %v3583_v47  ;;  %v1918_v63 = vmul.f32 %v3538_v7, %v3099_v22  ;;  %v1995_v48 = vsel %vm1187_vm5, %v1990_v41, %v1992_v6 }
 0x4aa   :  { %v1726_v7 = vrot.slane %v1719_v16, %v3677_v46 }
 0x4ab   :  { %v1589_v27 = vpop.permute.xlu1 %1588  ;;  %v2016_v9 = vadd.f32 %v2015_v14, %v1999_v3  ;;  %v2017_v57 = vadd.f32 %v2015_v14, %v2000_v49  ;;  %v1945_v10 = vadd.f32 %v1939_v19, %v1918_v63 }
 0x4ac   :  { %v1592_v38 = vsel %vm1187_vm5, %v1587_v0, %v1589_v27  ;;  %v1762_v0 = vsel %vm1130_vm4, %v1756_v52, %v3681_v25  ;;  %v2006_v52 = vrot.slane %v1912_v35, 2 }
 0x4ad   :  { %v1598_v45 = vadd.f32 %v1592_v38, %v3590_v39  ;;  %v1741_v39 = vmul.f32 %v1739_v21, %v3123_v17  ;;  %v1851_v17 = vsel %vm1130_vm4, %v3536_v13, %v1848_v31  ;;  %v2022_v58 = vrot.slane %v2016_v9, 4 }
 0x4ae   :  { %v1857_v31 = vadd.f32 %v1851_v17, %v1830_v23  ;;  %v2001_v36 = vadd.f32 %v1995_v48, %v1945_v10  ;;  %v2023_v41 = vrot.slane %v2017_v57, 4 }
 0x4af   :  { %v1692_v50 = vrot.slane %v1598_v45, 2  ;;  %v1760_v59 = vpop.permute.xlu1 %1759  ;;  %v1768_v32 = vadd.f32 %v1762_v0, %v1741_v39 }
 0x4b0   :  { %v1763_v53 = vsel %vm1130_vm4, %v3681_v25, %v1760_v59  ;;  %v2018_v62 = vadd.f32 %v2015_v14, %v2001_v36 }
 0x4b1   :  { %v1698_v47 = vadd.f32 %v1692_v50, %v1510_v4  ;;  %v1769_v27 = vadd.f32 %v1763_v53, %v1742_v24 }
 0x4b2   :  { %v2024_v45 = vrot.slane %v2018_v62, 4 }
 0x4b3   :  { %v1715_v28 = vadd.f32 %v1709_v61, %v1698_v47  ;;  %v1812_v5 = vpop.permute.xlu1 %1811 }
 0x4b4   :  { %v1817_v20 = vsel %vm1187_vm5, %v1810_v12, %v1812_v5  ;;  %v1818_v54 = vsel %vm1187_vm5, %v1812_v5, %v3704_v11 }
 0x4b5   :  { %v1733_v56 = vrot.slane %v1715_v28, %v3677_v46  ;;  %v1823_v34 = vadd.f32 %v1817_v20, %v1767_v18  ;;  %v1824_v13 = vadd.f32 %v1818_v54, %v1768_v32 }
 0x4b7   :  { %v2011_v40 = vadd.f32 %v2005_v44, %v1823_v34  ;;  %v2012_v43 = vadd.f32 %v2006_v52, %v1824_v13  ;;  %v1904_v60 = vpop.permute.xlu1 %1903  ;;  %v1734_v16 = vcombine.low %v1726_v7, %v1733_v56 }
 0x4b8   :  { %v1907_v12 = vsel %vm1187_vm5, %v3693_v29, %v1904_v60 }
 0x4b9   :  { %v2028_v1 = vadd.f32 %v2022_v58, %v2011_v40  ;;  %v2029_v33 = vadd.f32 %v2023_v41, %v2012_v43  ;;  %v1913_v30 = vadd.f32 %v1907_v12, %v1857_v31  ;;  %1737 = vst [vmem:[#allocation12 + $0x6] sm:$0x3f] %v1734_v16 }
 0x4bb   :  { %v2034_v2 = vcombine.low %v2028_v1, %v2029_v33  ;;  %v1816_v38 = vpop.permute.xlu1 %1815  ;;  %v2007_v55 = vrot.slane %v1913_v30, 2 }
 0x4bc   :  { %v1819_v37 = vsel %vm1187_vm5, %v3704_v11, %v1816_v38 }
 0x4bd   :  { %v1825_v42 = vadd.f32 %v1819_v37, %v1769_v27  ;;  %v2041_v22 = vrot.slane %v2034_v2, %v3677_v46 }
 0x4bf   :  { %v2013_v25 = vadd.f32 %v2007_v55, %v1825_v42 }
 0x4c1   :  { %v2030_v15 = vadd.f32 %v2024_v45, %v2013_v25 }
 0x4c3   :  { %v2048_v29 = vrot.slane %v2030_v15, %v3677_v46 }
 0x4c5   :  { %v2049_v21 = vcombine.low %v2041_v22, %v2048_v29 }
 0x4c7   :  { %2052 = vst [vmem:[#allocation12 + $0xc] sm:$0x3f] %v2049_v21 }
 0x4c8   :  { %2243 = shalt.err (!%p2240_p2)
}
 0x4c9   :  { %s2244_s30 = scalar_lea.hbm %s3768_s6, 288 }
 0x4ca   :  { %p2245_p3 = scmp.ne.s32.totalorder %s3768_s6, %s2244_s30  ;;  %p2248_p4 = scmp.lt.u32.totalorder %s2244_s30, %s3768_s6 }
 0x4cc   :  { %p2250_p5 = pnand %p2248_p4, %p2245_p3 }
 0x4ce   :  { %2253 = shalt.err (!%p2250_p5)
}
 0x4cf   :  { %s2275_s9 = smov 96   ;;  %s2276_s10 = smov 6  }
 0x4d0   :  { %2064 = dma.vmem_to_hbm [thread:$0]  %s2059_s26, 288, %s3768_s6, [#allocation4], %s2275_s9, %s2275_s9, %s2276_s10  }
 0x4d1   :  { %2262 = dma.done.wait [#allocation4], 288  }
 0x4d2   :  { %2263 = vsyncadd [#allocation4], 4294967008 }
 0x4d3   :  { %2068 = vsyncpa [#allocation3], 1 }
 0x4d4   :  { %2069 = vsyncpa [#allocation4], 1 }
 0x4d5   :  { %2070 = vsyncpa [#allocation5], 1 }
 0x4d6   :  { %2071 = vsyncpa [#allocation6], 1 }
 0x4d7   :  { %2072 = vsyncpa [#allocation9], 1 }

</bundles_post_ra>
